<compile_context>
chip_gen: v7x
topology: tpu7x:2x2x1
jax: 0.10.0
libtpu: 0.0.40
codegen_flags: <defaults>
</compile_context>

<pallas_src>
import functools
import math

import jax
import jax.numpy as jnp
from jax import lax
from jax.experimental import pallas as pl
from jax.experimental.pallas import tpu as pltpu


# ------------------------------ in-kernel helpers ------------------------------

def _layernorm(x, gamma, beta, eps=1e-5):
    # nn.LayerNorm over the last axis: biased variance, eps=1e-5 (f32 math).
    mean = jnp.mean(x, axis=-1, keepdims=True)
    var = jnp.mean(jnp.square(x - mean), axis=-1, keepdims=True)
    return (x - mean) * lax.rsqrt(var + eps) * gamma + beta


def _attention(q_all, k_all, v_all, ctx_ref, heads, causal):
    """Per-head attention. The 1/sqrt(dh) scale is pre-folded into the Q projection.

    q_all: (Sq, D) f32, k_all/v_all: (Sk, D) f32.  Writes the concat-heads context
    (Sq, D) directly into the VMEM scratch `ctx_ref` (no jnp.concatenate copy).
    """
    Sq, D = q_all.shape
    Sk = k_all.shape[0]
    dh = D // heads
    if causal:
        # Look-ahead mask generated in-kernel (VPU iota+compare), never DMA'd.
        row = lax.broadcasted_iota(jnp.int32, (Sq, Sk), 0)
        col = lax.broadcasted_iota(jnp.int32, (Sq, Sk), 1)
        keep = row >= col
    for h in range(heads):                      # static unroll; heads is small
        q = q_all[:, h * dh:(h + 1) * dh].astype(jnp.bfloat16)
        k = k_all[:, h * dh:(h + 1) * dh].astype(jnp.bfloat16)
        v = v_all[:, h * dh:(h + 1) * dh].astype(jnp.bfloat16)
        # q @ k^T via dot_general (contract dim 1 of both) — no in-kernel transpose.
        s = lax.dot_general(q, k, (((1,), (1,)), ((), ())),
                            preferred_element_type=jnp.float32)
        if causal:
            s = jnp.where(keep, s, jnp.float32(-1e20))
        m = jnp.max(s, axis=-1, keepdims=True)
        e = jnp.exp(s - m)
        p = e * pl.reciprocal(jnp.sum(e, axis=-1, keepdims=True), approx=True)
        ctx_ref[:, h * dh:(h + 1) * dh] = jnp.dot(
            p.astype(jnp.bfloat16), v, preferred_element_type=jnp.float32)


# ------------------------------ fused decoder-block kernel ------------------------------

def _decoder_block_kernel(x_ref, enc_ref,
                          wqkv_ref, swoT_ref, sbo_ref, n0g_ref, n0b_ref,
                          wqk_ref, wvT_ref, cwoT_ref, cbo_ref, n1g_ref, n1b_ref,
                          w1T_ref, b1_ref, w2T_ref, b2_ref, n2g_ref, n2b_ref,
                          o_ref, ctx_ref, *, heads, causal):
    blk = pl.program_id(1)

    # The output block is resident across the block axis (same index map) — use it as the
    # inter-block activation carry; seed it from the embedding+PE input at blk == 0.
    @pl.when(blk == 0)
    def _():
        o_ref[0] = x_ref[0]

    x = o_ref[0]                                   # (S, D) carried activation, f32
    enc = enc_ref[0]                               # (S, D) encoder output, f32
    D = x.shape[-1]

    # ---- stage 1: masked self-attention + Wo + residual + LayerNorm ----
    qkv = jnp.dot(x.astype(jnp.bfloat16), wqkv_ref[0],
                  preferred_element_type=jnp.float32)            # (S, 3D) fused QKV
    _attention(qkv[:, :D], qkv[:, D:2 * D], qkv[:, 2 * D:], ctx_ref, heads, causal)
    attn = jnp.dot(ctx_ref[...].astype(jnp.bfloat16), swoT_ref[0],
                   preferred_element_type=jnp.float32) + sbo_ref[0]
    value = _layernorm(attn + x, n0g_ref[0], n0b_ref[0])

    # ---- stage 2: cross-attention (q,k from encoder, v from decoder path) + LN ----
    qk = jnp.dot(enc.astype(jnp.bfloat16), wqk_ref[0],
                 preferred_element_type=jnp.float32)             # (S, 2D) fused QK
    v_all = jnp.dot(value.astype(jnp.bfloat16), wvT_ref[0],
                    preferred_element_type=jnp.float32)
    _attention(qk[:, :D], qk[:, D:], v_all, ctx_ref, heads, False)
    attn2 = jnp.dot(ctx_ref[...].astype(jnp.bfloat16), cwoT_ref[0],
                    preferred_element_type=jnp.float32) + cbo_ref[0]
    n1 = _layernorm(attn2 + value, n1g_ref[0], n1b_ref[0])

    # ---- stage 3: FFN + residual + LayerNorm ----
    hid = jnp.dot(n1.astype(jnp.bfloat16), w1T_ref[0],
                  preferred_element_type=jnp.float32) + b1_ref[0]
    hid = jnp.maximum(hid, 0.0)
    ffn = jnp.dot(hid.astype(jnp.bfloat16), w2T_ref[0],
                  preferred_element_type=jnp.float32) + b2_ref[0]
    o_ref[0] = _layernorm(ffn + n1, n2g_ref[0], n2b_ref[0])


# ------------------------------ wrapper ------------------------------

_WEIGHT_ORDER = ('self_wqkv', 'self_woT', 'self_bo', 'norm_g', 'norm_b',
                 'cross_wqk', 'cross_wvT', 'cross_woT', 'cross_bo',
                 'n1_g', 'n1_b', 'w1T', 'b1', 'w2T', 'b2', 'n2_g', 'n2_b')


def decoder_blocks_fused(x, enc, stacked, heads, causal):
    B, S, D = x.shape
    nblk = stacked['self_wqkv'].shape[0]
    Dff = stacked['w1T'].shape[-1]

    act_spec = pl.BlockSpec((1, S, D), lambda b, l: (b, 0, 0))

    def wspec(a):  # one block slab per decoder layer, indexed by the block grid axis
        return pl.BlockSpec((1,) + a.shape[1:], lambda b, l: (l, 0, 0))

    weights = [stacked[n] for n in _WEIGHT_ORDER]

    flops = int(B * nblk * (16 * S * D * D + 8 * S * S * D + 4 * S * D * Dff))
    transc = int(B * nblk * (2 * heads * S * S + 16 * S))
    wbytes = int(sum(w.size * w.dtype.itemsize for w in weights))
    bytes_accessed = int(B * wbytes + 3 * B * S * D * 4)

    kern = functools.partial(_decoder_block_kernel, heads=heads, causal=causal)
    return pl.pallas_call(
        kern,
        out_shape=jax.ShapeDtypeStruct((B, S, D), jnp.float32),
        grid=(B, nblk),
        in_specs=[act_spec, act_spec] + [wspec(w) for w in weights],
        out_specs=act_spec,
        scratch_shapes=[pltpu.VMEM((S, D), jnp.float32)],   # concat-heads context slab
        compiler_params=pltpu.CompilerParams(
            dimension_semantics=("parallel", "arbitrary")),
        cost_estimate=pl.CostEstimate(flops=flops, transcendentals=transc,
                                      bytes_accessed=bytes_accessed),
    )(x, enc, *weights)


# ------------------------------ model glue ------------------------------

def sinusoidal_pe(seq_len, d):
    pos = jnp.arange(seq_len, dtype=jnp.float32)[:, None]
    i = jnp.arange(d, dtype=jnp.float32)[None, :]
    angle_rates = 1.0 / jnp.power(10000.0, (2.0 * jnp.floor(i / 2.0)) / d)
    angles = pos * angle_rates
    pe = jnp.where((jnp.arange(d) % 2 == 0)[None, :], jnp.sin(angles), jnp.cos(angles))
    return pe.astype(jnp.float32)


def decoder_forward(tokens, enc_out, mask, fused_params, heads):
    D = fused_params['embedding'].shape[1]
    S = tokens.shape[1]
    # TODO(synk): embedding gather + positional add kept in plain JAX (glue);
    #             dropout is identity in eval mode.
    emb = jnp.take(fused_params['embedding'], tokens, axis=0)          # (B, S, D)
    x = emb * math.sqrt(D) + fused_params['pe'][None, :S, :]
    # The decoder's mask is the standard look-ahead mask; it is regenerated in-kernel
    # (iota compare) instead of being DMA'd.
    # TODO(synk): arbitrary data-dependent masks would be passed as a single int8 (S,S) block.
    causal = mask is not None
    return decoder_blocks_fused(x, enc_out, fused_params['blocks'], heads, causal)


# ------------------------------ parameters ------------------------------

def init_params(key, vocab, seq_len, D, heads, n_blocks, expansion):
    # Raw PyTorch-layout parameters (nn.Linear weight is (out, in)).
    dh = D // heads
    Dff = expansion * D
    keys = jax.random.split(key, 1 + n_blocks)
    lin = lambda k, shape: jax.random.normal(k, shape, jnp.float32) * 0.05
    params = {
        'embedding': jax.random.normal(keys[0], (vocab, D), jnp.float32) * 0.02,
        'pe': sinusoidal_pe(seq_len, D),
        'blocks': [],
    }
    for b in range(n_blocks):
        ks = jax.random.split(keys[1 + b], 10)
        blk = {
            'self_attn': {'Wq': lin(ks[0], (dh, dh)), 'Wk': lin(ks[1], (dh, dh)),
                          'Wv': lin(ks[2], (dh, dh)), 'Wo': lin(ks[3], (D, D)),
                          'bo': jnp.zeros((D,), jnp.float32)},
            'norm_g': jnp.ones((D,), jnp.float32), 'norm_b': jnp.zeros((D,), jnp.float32),
            'cross_attn': {'Wq': lin(ks[4], (dh, dh)), 'Wk': lin(ks[5], (dh, dh)),
                           'Wv': lin(ks[6], (dh, dh)), 'Wo': lin(ks[7], (D, D)),
                           'bo': jnp.zeros((D,), jnp.float32)},
            'n1_g': jnp.ones((D,), jnp.float32), 'n1_b': jnp.zeros((D,), jnp.float32),
            'W1': lin(ks[8], (Dff, D)), 'b1': jnp.zeros((Dff,), jnp.float32),
            'W2': lin(ks[9], (D, Dff)), 'b2': jnp.zeros((D,), jnp.float32),
            'n2_g': jnp.ones((D,), jnp.float32), 'n2_b': jnp.zeros((D,), jnp.float32),
        }
        params['blocks'].append(blk)
    return params


def prepare_params(params, heads):
    # One-time prep: per-head (dh,dh) weights -> block-diagonal (D,D) matrices
    # (x @ kron(I_H, W^T) == per-head x_h @ W^T), concatenated into fused QKV / QK
    # projections; 1/sqrt(dh) softmax scale folded into the Q columns; all matmul
    # weights pre-transposed to (K,N) and pre-cast to bf16; weights stacked along a
    # leading NBLK axis for the single fused pallas_call.
    # TODO(synk): on v5e with dh >= 128 the block-diagonal fusion inflates FLOPs by H —
    #             revert to per-head projections there.
    D = params['embedding'].shape[1]
    dh = D // heads
    scale = 1.0 / math.sqrt(dh)
    eyeH = jnp.eye(heads, dtype=jnp.float32)
    big = lambda w: jnp.kron(eyeH, w.T)                     # (D, D) block-diagonal
    bf = lambda w: w.astype(jnp.bfloat16)
    per_block = []
    for blk in params['blocks']:
        sa, ca = blk['self_attn'], blk['cross_attn']
        per_block.append(dict(
            self_wqkv=bf(jnp.concatenate(
                [big(sa['Wq']) * scale, big(sa['Wk']), big(sa['Wv'])], axis=1)),
            self_woT=bf(sa['Wo'].T),
            self_bo=sa['bo'].reshape(1, D),
            norm_g=blk['norm_g'].reshape(1, D), norm_b=blk['norm_b'].reshape(1, D),
            cross_wqk=bf(jnp.concatenate(
                [big(ca['Wq']) * scale, big(ca['Wk'])], axis=1)),
            cross_wvT=bf(big(ca['Wv'])),
            cross_woT=bf(ca['Wo'].T),
            cross_bo=ca['bo'].reshape(1, D),
            n1_g=blk['n1_g'].reshape(1, D), n1_b=blk['n1_b'].reshape(1, D),
            w1T=bf(blk['W1'].T), b1=blk['b1'].reshape(1, -1),
            w2T=bf(blk['W2'].T), b2=blk['b2'].reshape(1, D),
            n2_g=blk['n2_g'].reshape(1, D), n2_b=blk['n2_b'].reshape(1, D),
        ))
    stacked = {k: jnp.stack([pb[k] for pb in per_block], axis=0) for k in per_block[0]}
    return {'embedding': params['embedding'], 'pe': params['pe'], 'blocks': stacked}


# ------------------------------ test driver ------------------------------

if __name__ == "__main__":
    B, S, D, H, EXP, NBLK, VOCAB = 2, 8, 32, 4, 4, 2, 50

    root = jax.random.PRNGKey(0)
    k_tok, k_enc, k_par = jax.random.split(root, 3)

    tokens = jax.random.randint(k_tok, (B, S), 0, VOCAB, dtype=jnp.int32)
    encoder_output = jax.random.normal(k_enc, (B, S, D), jnp.float32)
    # look-ahead mask (batch, 1, S, S): 1 = attend, 0 = masked (regenerated in-kernel)
    mask = jnp.broadcast_to(
        jnp.tril(jnp.ones((S, S), jnp.float32))[None, None, :, :], (B, 1, S, S))

    raw_params = init_params(k_par, VOCAB, S, D, H, NBLK, EXP)
    fused_params = prepare_params(raw_params, H)

    out = decoder_forward(tokens, encoder_output, mask, fused_params, H)
    out = jax.block_until_ready(out)
    assert out.shape == (B, S, D) and out.dtype == jnp.float32
    assert bool(jnp.all(jnp.isfinite(out)))
    print("KERNEL_OK")
</pallas_src>

<mosaic_0001>
module attributes {stable_mosaic.version = 11 : i64} {
  func.func @_decoder_block_kernel(%arg0: i32, %arg1: i32, %arg2: memref<1x8x32xf32, #tpu.memory_space<vmem>>, %arg3: memref<1x8x32xf32, #tpu.memory_space<vmem>>, %arg4: memref<1x32x96xbf16, #tpu.memory_space<vmem>>, %arg5: memref<1x32x32xbf16, #tpu.memory_space<vmem>>, %arg6: memref<1x1x32xf32, #tpu.memory_space<vmem>>, %arg7: memref<1x1x32xf32, #tpu.memory_space<vmem>>, %arg8: memref<1x1x32xf32, #tpu.memory_space<vmem>>, %arg9: memref<1x32x64xbf16, #tpu.memory_space<vmem>>, %arg10: memref<1x32x32xbf16, #tpu.memory_space<vmem>>, %arg11: memref<1x32x32xbf16, #tpu.memory_space<vmem>>, %arg12: memref<1x1x32xf32, #tpu.memory_space<vmem>>, %arg13: memref<1x1x32xf32, #tpu.memory_space<vmem>>, %arg14: memref<1x1x32xf32, #tpu.memory_space<vmem>>, %arg15: memref<1x32x128xbf16, #tpu.memory_space<vmem>>, %arg16: memref<1x1x128xf32, #tpu.memory_space<vmem>>, %arg17: memref<1x128x32xbf16, #tpu.memory_space<vmem>>, %arg18: memref<1x1x32xf32, #tpu.memory_space<vmem>>, %arg19: memref<1x1x32xf32, #tpu.memory_space<vmem>>, %arg20: memref<1x1x32xf32, #tpu.memory_space<vmem>>, %arg21: memref<1x8x32xf32, #tpu.memory_space<vmem>>, %arg22: memref<8x32xf32, #tpu.memory_space<vmem>>) attributes {dimension_semantics = [#tpu.dimension_semantics<parallel>, #tpu.dimension_semantics<arbitrary>], iteration_bounds = array<i64: 2, 2>, scalar_prefetch = 0 : i64, scratch_operands = 1 : i64, tpu.core_type = #tpu.core_type<tc>, window_params = [{transform_indices = @transform_0, window_bounds = array<i64: 1, 8, 32>}, {transform_indices = @transform_1, window_bounds = array<i64: 1, 8, 32>}, {transform_indices = @transform_2, window_bounds = array<i64: 1, 32, 96>}, {transform_indices = @transform_3, window_bounds = array<i64: 1, 32, 32>}, {transform_indices = @transform_4, window_bounds = array<i64: 1, 1, 32>}, {transform_indices = @transform_5, window_bounds = array<i64: 1, 1, 32>}, {transform_indices = @transform_6, window_bounds = array<i64: 1, 1, 32>}, {transform_indices = @transform_7, window_bounds = array<i64: 1, 32, 64>}, {transform_indices = @transform_8, window_bounds = array<i64: 1, 32, 32>}, {transform_indices = @transform_9, window_bounds = array<i64: 1, 32, 32>}, {transform_indices = @transform_10, window_bounds = array<i64: 1, 1, 32>}, {transform_indices = @transform_11, window_bounds = array<i64: 1, 1, 32>}, {transform_indices = @transform_12, window_bounds = array<i64: 1, 1, 32>}, {transform_indices = @transform_13, window_bounds = array<i64: 1, 32, 128>}, {transform_indices = @transform_14, window_bounds = array<i64: 1, 1, 128>}, {transform_indices = @transform_15, window_bounds = array<i64: 1, 128, 32>}, {transform_indices = @transform_16, window_bounds = array<i64: 1, 1, 32>}, {transform_indices = @transform_17, window_bounds = array<i64: 1, 1, 32>}, {transform_indices = @transform_18, window_bounds = array<i64: 1, 1, 32>}, {transform_indices = @transform_19, window_bounds = array<i64: 1, 8, 32>}]} {
    %c0_i32 = arith.constant 0 : i32
    %0 = arith.cmpi eq, %arg1, %c0_i32 : i32
    %1 = arith.extui %0 : i1 to i32
    %c0_i32_0 = arith.constant 0 : i32
    %2 = arith.cmpi ne, %1, %c0_i32_0 : i32
    scf.if %2 {
      %c0_135 = arith.constant 0 : index
      %c0_136 = arith.constant 0 : index
      %c0_137 = arith.constant 0 : index
      %315 = vector.load %arg2[%c0_135, %c0_136, %c0_137] : memref<1x8x32xf32, #tpu.memory_space<vmem>>, vector<1x8x32xf32>
      %316 = vector.shape_cast %315 : vector<1x8x32xf32> to vector<8x32xf32>
      %c0_138 = arith.constant 0 : index
      %c0_139 = arith.constant 0 : index
      %c0_140 = arith.constant 0 : index
      %317 = vector.load %arg21[%c0_138, %c0_139, %c0_140] : memref<1x8x32xf32, #tpu.memory_space<vmem>>, vector<1x8x32xf32>
      %318 = vector.shape_cast %317 : vector<1x8x32xf32> to vector<8x32xf32>
      %319 = vector.shape_cast %316 : vector<8x32xf32> to vector<1x8x32xf32>
      tpu.vector_store %arg21[%c0_138, %c0_139, %c0_140], %319 {strides = array<i32>} : memref<1x8x32xf32, #tpu.memory_space<vmem>>, vector<1x8x32xf32>,
    } else {
    }
    %c0 = arith.constant 0 : index
    %c0_1 = arith.constant 0 : index
    %c0_2 = arith.constant 0 : index
    %3 = vector.load %arg21[%c0, %c0_1, %c0_2] : memref<1x8x32xf32, #tpu.memory_space<vmem>>, vector<1x8x32xf32>
    %4 = vector.shape_cast %3 : vector<1x8x32xf32> to vector<8x32xf32>
    %c0_3 = arith.constant 0 : index
    %c0_4 = arith.constant 0 : index
    %c0_5 = arith.constant 0 : index
    %5 = vector.load %arg3[%c0_3, %c0_4, %c0_5] : memref<1x8x32xf32, #tpu.memory_space<vmem>>, vector<1x8x32xf32>
    %6 = vector.shape_cast %5 : vector<1x8x32xf32> to vector<8x32xf32>
    %7 = arith.truncf %4 : vector<8x32xf32> to vector<8x32xbf16>
    %c0_6 = arith.constant 0 : index
    %c0_7 = arith.constant 0 : index
    %c0_8 = arith.constant 0 : index
    %8 = vector.load %arg4[%c0_6, %c0_7, %c0_8] : memref<1x32x96xbf16, #tpu.memory_space<vmem>>, vector<1x32x96xbf16>
    %9 = vector.shape_cast %8 : vector<1x32x96xbf16> to vector<32x96xbf16>
    %cst = arith.constant dense<0.000000e+00> : vector<8x96xf32>
    %10 = tpu.matmul %7, %9, %cst {dimension_numbers = #tpu.dot_dimension_numbers<[1], [0], [0], [1], [0, 0, 1, 1], [], []>} : vector<8x32xbf16>, vector<32x96xbf16>, vector<8x96xf32> -> vector<8x96xf32>
    %11 = vector.extract_strided_slice %10 {offsets = [0, 0], sizes = [8, 32], strides = [1, 1]} : vector<8x96xf32> to vector<8x32xf32>
    %12 = vector.extract_strided_slice %10 {offsets = [0, 32], sizes = [8, 32], strides = [1, 1]} : vector<8x96xf32> to vector<8x32xf32>
    %13 = vector.extract_strided_slice %10 {offsets = [0, 64], sizes = [8, 32], strides = [1, 1]} : vector<8x96xf32> to vector<8x32xf32>
    %14 = tpu.iota {dimensions = array<i32: 0>} : vector<8x8xi32>
    %15 = tpu.iota {dimensions = array<i32: 1>} : vector<8x8xi32>
    %16 = arith.cmpi sge, %14, %15 : vector<8x8xi32>
    %17 = vector.extract_strided_slice %11 {offsets = [0, 0], sizes = [8, 8], strides = [1, 1]} : vector<8x32xf32> to vector<8x8xf32>
    %18 = arith.truncf %17 : vector<8x8xf32> to vector<8x8xbf16>
    %19 = vector.extract_strided_slice %12 {offsets = [0, 0], sizes = [8, 8], strides = [1, 1]} : vector<8x32xf32> to vector<8x8xf32>
    %20 = arith.truncf %19 : vector<8x8xf32> to vector<8x8xbf16>
    %21 = vector.extract_strided_slice %13 {offsets = [0, 0], sizes = [8, 8], strides = [1, 1]} : vector<8x32xf32> to vector<8x8xf32>
    %22 = arith.truncf %21 : vector<8x8xf32> to vector<8x8xbf16>
    %cst_9 = arith.constant dense<0.000000e+00> : vector<8x8xf32>
    %23 = tpu.matmul %18, %20, %cst_9 {dimension_numbers = #tpu.dot_dimension_numbers<[1], [1], [0], [0], [0, 0, 1, 0], [], []>} : vector<8x8xbf16>, vector<8x8xbf16>, vector<8x8xf32> -> vector<8x8xf32>
    %cst_10 = arith.constant -1.000000e+20 : f32
    %24 = vector.broadcast %cst_10 : f32 to vector<8x8xf32>
    %25 = arith.select %16, %23, %24 : vector<8x8xi1>, vector<8x8xf32>
    %cst_11 = arith.constant dense<0xFF800000> : vector<8xf32>
    %26 = vector.multi_reduction <maximumf>, %25, %cst_11 [1] : vector<8x8xf32> to vector<8xf32>
    %27 = vector.shape_cast %26 : vector<8xf32> to vector<8x1xf32>
    %28 = vector.broadcast %27 : vector<8x1xf32> to vector<8x8xf32>
    %29 = arith.subf %25, %28 : vector<8x8xf32>
    %30 = math.exp %29 : vector<8x8xf32>
    %cst_12 = arith.constant dense<0.000000e+00> : vector<8xf32>
    %31 = vector.multi_reduction <add>, %30, %cst_12 [1] : vector<8x8xf32> to vector<8xf32>
    %32 = vector.shape_cast %31 : vector<8xf32> to vector<8x1xf32>
    %33 = tpu.reciprocal %32 {approx = true} : vector<8x1xf32> -> vector<8x1xf32>
    %34 = vector.broadcast %33 : vector<8x1xf32> to vector<8x8xf32>
    %35 = arith.mulf %30, %34 : vector<8x8xf32>
    %36 = arith.truncf %35 : vector<8x8xf32> to vector<8x8xbf16>
    %cst_13 = arith.constant dense<0.000000e+00> : vector<8x8xf32>
    %37 = tpu.matmul %36, %22, %cst_13 {dimension_numbers = #tpu.dot_dimension_numbers<[1], [0], [0], [1], [0, 0, 1, 1], [], []>} : vector<8x8xbf16>, vector<8x8xbf16>, vector<8x8xf32> -> vector<8x8xf32>
    %c0_14 = arith.constant 0 : index
    %c0_15 = arith.constant 0 : index
    %38 = vector.load %arg22[%c0_14, %c0_15] : memref<8x32xf32, #tpu.memory_space<vmem>>, vector<8x8xf32>
    tpu.vector_store %arg22[%c0_14, %c0_15], %37 {strides = array<i32>} : memref<8x32xf32, #tpu.memory_space<vmem>>, vector<8x8xf32>,
    %39 = vector.extract_strided_slice %11 {offsets = [0, 8], sizes = [8, 8], strides = [1, 1]} : vector<8x32xf32> to vector<8x8xf32>
    %40 = arith.truncf %39 : vector<8x8xf32> to vector<8x8xbf16>
    %41 = vector.extract_strided_slice %12 {offsets = [0, 8], sizes = [8, 8], strides = [1, 1]} : vector<8x32xf32> to vector<8x8xf32>
    %42 = arith.truncf %41 : vector<8x8xf32> to vector<8x8xbf16>
    %43 = vector.extract_strided_slice %13 {offsets = [0, 8], sizes = [8, 8], strides = [1, 1]} : vector<8x32xf32> to vector<8x8xf32>
    %44 = arith.truncf %43 : vector<8x8xf32> to vector<8x8xbf16>
    %cst_16 = arith.constant dense<0.000000e+00> : vector<8x8xf32>
    %45 = tpu.matmul %40, %42, %cst_16 {dimension_numbers = #tpu.dot_dimension_numbers<[1], [1], [0], [0], [0, 0, 1, 0], [], []>} : vector<8x8xbf16>, vector<8x8xbf16>, vector<8x8xf32> -> vector<8x8xf32>
    %cst_17 = arith.constant -1.000000e+20 : f32
    %46 = vector.broadcast %cst_17 : f32 to vector<8x8xf32>
    %47 = arith.select %16, %45, %46 : vector<8x8xi1>, vector<8x8xf32>
    %cst_18 = arith.constant dense<0xFF800000> : vector<8xf32>
    %48 = vector.multi_reduction <maximumf>, %47, %cst_18 [1] : vector<8x8xf32> to vector<8xf32>
    %49 = vector.shape_cast %48 : vector<8xf32> to vector<8x1xf32>
    %50 = vector.broadcast %49 : vector<8x1xf32> to vector<8x8xf32>
    %51 = arith.subf %47, %50 : vector<8x8xf32>
    %52 = math.exp %51 : vector<8x8xf32>
    %cst_19 = arith.constant dense<0.000000e+00> : vector<8xf32>
    %53 = vector.multi_reduction <add>, %52, %cst_19 [1] : vector<8x8xf32> to vector<8xf32>
    %54 = vector.shape_cast %53 : vector<8xf32> to vector<8x1xf32>
    %55 = tpu.reciprocal %54 {approx = true} : vector<8x1xf32> -> vector<8x1xf32>
    %56 = vector.broadcast %55 : vector<8x1xf32> to vector<8x8xf32>
    %57 = arith.mulf %52, %56 : vector<8x8xf32>
    %58 = arith.truncf %57 : vector<8x8xf32> to vector<8x8xbf16>
    %cst_20 = arith.constant dense<0.000000e+00> : vector<8x8xf32>
    %59 = tpu.matmul %58, %44, %cst_20 {dimension_numbers = #tpu.dot_dimension_numbers<[1], [0], [0], [1], [0, 0, 1, 1], [], []>} : vector<8x8xbf16>, vector<8x8xbf16>, vector<8x8xf32> -> vector<8x8xf32>
    %c0_21 = arith.constant 0 : index
    %c8 = arith.constant 8 : index
    %60 = vector.load %arg22[%c0_21, %c8] : memref<8x32xf32, #tpu.memory_space<vmem>>, vector<8x8xf32>
    tpu.vector_store %arg22[%c0_21, %c8], %59 {strides = array<i32>} : memref<8x32xf32, #tpu.memory_space<vmem>>, vector<8x8xf32>,
    %61 = vector.extract_strided_slice %11 {offsets = [0, 16], sizes = [8, 8], strides = [1, 1]} : vector<8x32xf32> to vector<8x8xf32>
    %62 = arith.truncf %61 : vector<8x8xf32> to vector<8x8xbf16>
    %63 = vector.extract_strided_slice %12 {offsets = [0, 16], sizes = [8, 8], strides = [1, 1]} : vector<8x32xf32> to vector<8x8xf32>
    %64 = arith.truncf %63 : vector<8x8xf32> to vector<8x8xbf16>
    %65 = vector.extract_strided_slice %13 {offsets = [0, 16], sizes = [8, 8], strides = [1, 1]} : vector<8x32xf32> to vector<8x8xf32>
    %66 = arith.truncf %65 : vector<8x8xf32> to vector<8x8xbf16>
    %cst_22 = arith.constant dense<0.000000e+00> : vector<8x8xf32>
    %67 = tpu.matmul %62, %64, %cst_22 {dimension_numbers = #tpu.dot_dimension_numbers<[1], [1], [0], [0], [0, 0, 1, 0], [], []>} : vector<8x8xbf16>, vector<8x8xbf16>, vector<8x8xf32> -> vector<8x8xf32>
    %cst_23 = arith.constant -1.000000e+20 : f32
    %68 = vector.broadcast %cst_23 : f32 to vector<8x8xf32>
    %69 = arith.select %16, %67, %68 : vector<8x8xi1>, vector<8x8xf32>
    %cst_24 = arith.constant dense<0xFF800000> : vector<8xf32>
    %70 = vector.multi_reduction <maximumf>, %69, %cst_24 [1] : vector<8x8xf32> to vector<8xf32>
    %71 = vector.shape_cast %70 : vector<8xf32> to vector<8x1xf32>
    %72 = vector.broadcast %71 : vector<8x1xf32> to vector<8x8xf32>
    %73 = arith.subf %69, %72 : vector<8x8xf32>
    %74 = math.exp %73 : vector<8x8xf32>
    %cst_25 = arith.constant dense<0.000000e+00> : vector<8xf32>
    %75 = vector.multi_reduction <add>, %74, %cst_25 [1] : vector<8x8xf32> to vector<8xf32>
    %76 = vector.shape_cast %75 : vector<8xf32> to vector<8x1xf32>
    %77 = tpu.reciprocal %76 {approx = true} : vector<8x1xf32> -> vector<8x1xf32>
    %78 = vector.broadcast %77 : vector<8x1xf32> to vector<8x8xf32>
    %79 = arith.mulf %74, %78 : vector<8x8xf32>
    %80 = arith.truncf %79 : vector<8x8xf32> to vector<8x8xbf16>
    %cst_26 = arith.constant dense<0.000000e+00> : vector<8x8xf32>
    %81 = tpu.matmul %80, %66, %cst_26 {dimension_numbers = #tpu.dot_dimension_numbers<[1], [0], [0], [1], [0, 0, 1, 1], [], []>} : vector<8x8xbf16>, vector<8x8xbf16>, vector<8x8xf32> -> vector<8x8xf32>
    %c0_27 = arith.constant 0 : index
    %c16 = arith.constant 16 : index
    %82 = vector.load %arg22[%c0_27, %c16] : memref<8x32xf32, #tpu.memory_space<vmem>>, vector<8x8xf32>
    tpu.vector_store %arg22[%c0_27, %c16], %81 {strides = array<i32>} : memref<8x32xf32, #tpu.memory_space<vmem>>, vector<8x8xf32>,
    %83 = vector.extract_strided_slice %11 {offsets = [0, 24], sizes = [8, 8], strides = [1, 1]} : vector<8x32xf32> to vector<8x8xf32>
    %84 = arith.truncf %83 : vector<8x8xf32> to vector<8x8xbf16>
    %85 = vector.extract_strided_slice %12 {offsets = [0, 24], sizes = [8, 8], strides = [1, 1]} : vector<8x32xf32> to vector<8x8xf32>
    %86 = arith.truncf %85 : vector<8x8xf32> to vector<8x8xbf16>
    %87 = vector.extract_strided_slice %13 {offsets = [0, 24], sizes = [8, 8], strides = [1, 1]} : vector<8x32xf32> to vector<8x8xf32>
    %88 = arith.truncf %87 : vector<8x8xf32> to vector<8x8xbf16>
    %cst_28 = arith.constant dense<0.000000e+00> : vector<8x8xf32>
    %89 = tpu.matmul %84, %86, %cst_28 {dimension_numbers = #tpu.dot_dimension_numbers<[1], [1], [0], [0], [0, 0, 1, 0], [], []>} : vector<8x8xbf16>, vector<8x8xbf16>, vector<8x8xf32> -> vector<8x8xf32>
    %cst_29 = arith.constant -1.000000e+20 : f32
    %90 = vector.broadcast %cst_29 : f32 to vector<8x8xf32>
    %91 = arith.select %16, %89, %90 : vector<8x8xi1>, vector<8x8xf32>
    %cst_30 = arith.constant dense<0xFF800000> : vector<8xf32>
    %92 = vector.multi_reduction <maximumf>, %91, %cst_30 [1] : vector<8x8xf32> to vector<8xf32>
    %93 = vector.shape_cast %92 : vector<8xf32> to vector<8x1xf32>
    %94 = vector.broadcast %93 : vector<8x1xf32> to vector<8x8xf32>
    %95 = arith.subf %91, %94 : vector<8x8xf32>
    %96 = math.exp %95 : vector<8x8xf32>
    %cst_31 = arith.constant dense<0.000000e+00> : vector<8xf32>
    %97 = vector.multi_reduction <add>, %96, %cst_31 [1] : vector<8x8xf32> to vector<8xf32>
    %98 = vector.shape_cast %97 : vector<8xf32> to vector<8x1xf32>
    %99 = tpu.reciprocal %98 {approx = true} : vector<8x1xf32> -> vector<8x1xf32>
    %100 = vector.broadcast %99 : vector<8x1xf32> to vector<8x8xf32>
    %101 = arith.mulf %96, %100 : vector<8x8xf32>
    %102 = arith.truncf %101 : vector<8x8xf32> to vector<8x8xbf16>
    %cst_32 = arith.constant dense<0.000000e+00> : vector<8x8xf32>
    %103 = tpu.matmul %102, %88, %cst_32 {dimension_numbers = #tpu.dot_dimension_numbers<[1], [0], [0], [1], [0, 0, 1, 1], [], []>} : vector<8x8xbf16>, vector<8x8xbf16>, vector<8x8xf32> -> vector<8x8xf32>
    %c0_33 = arith.constant 0 : index
    %c24 = arith.constant 24 : index
    %104 = vector.load %arg22[%c0_33, %c24] : memref<8x32xf32, #tpu.memory_space<vmem>>, vector<8x8xf32>
    tpu.vector_store %arg22[%c0_33, %c24], %103 {strides = array<i32>} : memref<8x32xf32, #tpu.memory_space<vmem>>, vector<8x8xf32>,
    %c0_34 = arith.constant 0 : index
    %c0_35 = arith.constant 0 : index
    %105 = vector.load %arg22[%c0_34, %c0_35] : memref<8x32xf32, #tpu.memory_space<vmem>>, vector<8x32xf32>
    %106 = arith.truncf %105 : vector<8x32xf32> to vector<8x32xbf16>
    %c0_36 = arith.constant 0 : index
    %c0_37 = arith.constant 0 : index
    %c0_38 = arith.constant 0 : index
    %107 = vector.load %arg5[%c0_36, %c0_37, %c0_38] : memref<1x32x32xbf16, #tpu.memory_space<vmem>>, vector<1x32x32xbf16>
    %108 = vector.shape_cast %107 : vector<1x32x32xbf16> to vector<32x32xbf16>
    %cst_39 = arith.constant dense<0.000000e+00> : vector<8x32xf32>
    %109 = tpu.matmul %106, %108, %cst_39 {dimension_numbers = #tpu.dot_dimension_numbers<[1], [0], [0], [1], [0, 0, 1, 1], [], []>} : vector<8x32xbf16>, vector<32x32xbf16>, vector<8x32xf32> -> vector<8x32xf32>
    %c0_40 = arith.constant 0 : index
    %c0_41 = arith.constant 0 : index
    %c0_42 = arith.constant 0 : index
    %110 = vector.load %arg6[%c0_40, %c0_41, %c0_42] : memref<1x1x32xf32, #tpu.memory_space<vmem>>, vector<1x1x32xf32>
    %111 = vector.shape_cast %110 : vector<1x1x32xf32> to vector<1x32xf32>
    %112 = vector.broadcast %111 : vector<1x32xf32> to vector<8x32xf32>
    %113 = arith.addf %109, %112 : vector<8x32xf32>
    %114 = arith.addf %113, %4 : vector<8x32xf32>
    %c0_43 = arith.constant 0 : index
    %c0_44 = arith.constant 0 : index
    %c0_45 = arith.constant 0 : index
    %115 = vector.load %arg7[%c0_43, %c0_44, %c0_45] : memref<1x1x32xf32, #tpu.memory_space<vmem>>, vector<1x1x32xf32>
    %116 = vector.shape_cast %115 : vector<1x1x32xf32> to vector<1x32xf32>
    %c0_46 = arith.constant 0 : index
    %c0_47 = arith.constant 0 : index
    %c0_48 = arith.constant 0 : index
    %117 = vector.load %arg8[%c0_46, %c0_47, %c0_48] : memref<1x1x32xf32, #tpu.memory_space<vmem>>, vector<1x1x32xf32>
    %118 = vector.shape_cast %117 : vector<1x1x32xf32> to vector<1x32xf32>
    %cst_49 = arith.constant dense<0.000000e+00> : vector<8xf32>
    %119 = vector.multi_reduction <add>, %114, %cst_49 [1] : vector<8x32xf32> to vector<8xf32>
    %120 = vector.shape_cast %119 : vector<8xf32> to vector<8x1xf32>
    %cst_50 = arith.constant 3.200000e+01 : f32
    %121 = vector.broadcast %cst_50 : f32 to vector<8x1xf32>
    %122 = arith.divf %120, %121 : vector<8x1xf32>
    %123 = vector.broadcast %122 : vector<8x1xf32> to vector<8x32xf32>
    %124 = arith.subf %114, %123 : vector<8x32xf32>
    %125 = arith.mulf %124, %124 : vector<8x32xf32>
    %cst_51 = arith.constant dense<0.000000e+00> : vector<8xf32>
    %126 = vector.multi_reduction <add>, %125, %cst_51 [1] : vector<8x32xf32> to vector<8xf32>
    %127 = vector.shape_cast %126 : vector<8xf32> to vector<8x1xf32>
    %cst_52 = arith.constant 3.200000e+01 : f32
    %128 = vector.broadcast %cst_52 : f32 to vector<8x1xf32>
    %129 = arith.divf %127, %128 : vector<8x1xf32>
    %130 = vector.broadcast %122 : vector<8x1xf32> to vector<8x32xf32>
    %131 = arith.subf %114, %130 : vector<8x32xf32>
    %cst_53 = arith.constant 9.99999974E-6 : f32
    %132 = vector.broadcast %cst_53 : f32 to vector<8x1xf32>
    %133 = arith.addf %129, %132 : vector<8x1xf32>
    %134 = math.rsqrt %133 : vector<8x1xf32>
    %135 = vector.broadcast %134 : vector<8x1xf32> to vector<8x32xf32>
    %136 = arith.mulf %131, %135 : vector<8x32xf32>
    %137 = vector.broadcast %116 : vector<1x32xf32> to vector<8x32xf32>
    %138 = arith.mulf %136, %137 : vector<8x32xf32>
    %139 = vector.broadcast %118 : vector<1x32xf32> to vector<8x32xf32>
    %140 = arith.addf %138, %139 : vector<8x32xf32>
    %141 = arith.truncf %6 : vector<8x32xf32> to vector<8x32xbf16>
    %c0_54 = arith.constant 0 : index
    %c0_55 = arith.constant 0 : index
    %c0_56 = arith.constant 0 : index
    %142 = vector.load %arg9[%c0_54, %c0_55, %c0_56] : memref<1x32x64xbf16, #tpu.memory_space<vmem>>, vector<1x32x64xbf16>
    %143 = vector.shape_cast %142 : vector<1x32x64xbf16> to vector<32x64xbf16>
    %cst_57 = arith.constant dense<0.000000e+00> : vector<8x64xf32>
    %144 = tpu.matmul %141, %143, %cst_57 {dimension_numbers = #tpu.dot_dimension_numbers<[1], [0], [0], [1], [0, 0, 1, 1], [], []>} : vector<8x32xbf16>, vector<32x64xbf16>, vector<8x64xf32> -> vector<8x64xf32>
    %145 = arith.truncf %140 : vector<8x32xf32> to vector<8x32xbf16>
    %c0_58 = arith.constant 0 : index
    %c0_59 = arith.constant 0 : index
    %c0_60 = arith.constant 0 : index
    %146 = vector.load %arg10[%c0_58, %c0_59, %c0_60] : memref<1x32x32xbf16, #tpu.memory_space<vmem>>, vector<1x32x32xbf16>
    %147 = vector.shape_cast %146 : vector<1x32x32xbf16> to vector<32x32xbf16>
    %cst_61 = arith.constant dense<0.000000e+00> : vector<8x32xf32>
    %148 = tpu.matmul %145, %147, %cst_61 {dimension_numbers = #tpu.dot_dimension_numbers<[1], [0], [0], [1], [0, 0, 1, 1], [], []>} : vector<8x32xbf16>, vector<32x32xbf16>, vector<8x32xf32> -> vector<8x32xf32>
    %149 = vector.extract_strided_slice %144 {offsets = [0, 0], sizes = [8, 32], strides = [1, 1]} : vector<8x64xf32> to vector<8x32xf32>
    %150 = vector.extract_strided_slice %144 {offsets = [0, 32], sizes = [8, 32], strides = [1, 1]} : vector<8x64xf32> to vector<8x32xf32>
    %151 = vector.extract_strided_slice %149 {offsets = [0, 0], sizes = [8, 8], strides = [1, 1]} : vector<8x32xf32> to vector<8x8xf32>
    %152 = arith.truncf %151 : vector<8x8xf32> to vector<8x8xbf16>
    %153 = vector.extract_strided_slice %150 {offsets = [0, 0], sizes = [8, 8], strides = [1, 1]} : vector<8x32xf32> to vector<8x8xf32>
    %154 = arith.truncf %153 : vector<8x8xf32> to vector<8x8xbf16>
    %155 = vector.extract_strided_slice %148 {offsets = [0, 0], sizes = [8, 8], strides = [1, 1]} : vector<8x32xf32> to vector<8x8xf32>
    %156 = arith.truncf %155 : vector<8x8xf32> to vector<8x8xbf16>
    %cst_62 = arith.constant dense<0.000000e+00> : vector<8x8xf32>
    %157 = tpu.matmul %152, %154, %cst_62 {dimension_numbers = #tpu.dot_dimension_numbers<[1], [1], [0], [0], [0, 0, 1, 0], [], []>} : vector<8x8xbf16>, vector<8x8xbf16>, vector<8x8xf32> -> vector<8x8xf32>
    %cst_63 = arith.constant dense<0xFF800000> : vector<8xf32>
    %158 = vector.multi_reduction <maximumf>, %157, %cst_63 [1] : vector<8x8xf32> to vector<8xf32>
    %159 = vector.shape_cast %158 : vector<8xf32> to vector<8x1xf32>
    %160 = vector.broadcast %159 : vector<8x1xf32> to vector<8x8xf32>
    %161 = arith.subf %157, %160 : vector<8x8xf32>
    %162 = math.exp %161 : vector<8x8xf32>
    %cst_64 = arith.constant dense<0.000000e+00> : vector<8xf32>
    %163 = vector.multi_reduction <add>, %162, %cst_64 [1] : vector<8x8xf32> to vector<8xf32>
    %164 = vector.shape_cast %163 : vector<8xf32> to vector<8x1xf32>
    %165 = tpu.reciprocal %164 {approx = true} : vector<8x1xf32> -> vector<8x1xf32>
    %166 = vector.broadcast %165 : vector<8x1xf32> to vector<8x8xf32>
    %167 = arith.mulf %162, %166 : vector<8x8xf32>
    %168 = arith.truncf %167 : vector<8x8xf32> to vector<8x8xbf16>
    %cst_65 = arith.constant dense<0.000000e+00> : vector<8x8xf32>
    %169 = tpu.matmul %168, %156, %cst_65 {dimension_numbers = #tpu.dot_dimension_numbers<[1], [0], [0], [1], [0, 0, 1, 1], [], []>} : vector<8x8xbf16>, vector<8x8xbf16>, vector<8x8xf32> -> vector<8x8xf32>
    %c0_66 = arith.constant 0 : index
    %c0_67 = arith.constant 0 : index
    %170 = vector.load %arg22[%c0_66, %c0_67] : memref<8x32xf32, #tpu.memory_space<vmem>>, vector<8x8xf32>
    tpu.vector_store %arg22[%c0_66, %c0_67], %169 {strides = array<i32>} : memref<8x32xf32, #tpu.memory_space<vmem>>, vector<8x8xf32>,
    %171 = vector.extract_strided_slice %149 {offsets = [0, 8], sizes = [8, 8], strides = [1, 1]} : vector<8x32xf32> to vector<8x8xf32>
    %172 = arith.truncf %171 : vector<8x8xf32> to vector<8x8xbf16>
    %173 = vector.extract_strided_slice %150 {offsets = [0, 8], sizes = [8, 8], strides = [1, 1]} : vector<8x32xf32> to vector<8x8xf32>
    %174 = arith.truncf %173 : vector<8x8xf32> to vector<8x8xbf16>
    %175 = vector.extract_strided_slice %148 {offsets = [0, 8], sizes = [8, 8], strides = [1, 1]} : vector<8x32xf32> to vector<8x8xf32>
    %176 = arith.truncf %175 : vector<8x8xf32> to vector<8x8xbf16>
    %cst_68 = arith.constant dense<0.000000e+00> : vector<8x8xf32>
    %177 = tpu.matmul %172, %174, %cst_68 {dimension_numbers = #tpu.dot_dimension_numbers<[1], [1], [0], [0], [0, 0, 1, 0], [], []>} : vector<8x8xbf16>, vector<8x8xbf16>, vector<8x8xf32> -> vector<8x8xf32>
    %cst_69 = arith.constant dense<0xFF800000> : vector<8xf32>
    %178 = vector.multi_reduction <maximumf>, %177, %cst_69 [1] : vector<8x8xf32> to vector<8xf32>
    %179 = vector.shape_cast %178 : vector<8xf32> to vector<8x1xf32>
    %180 = vector.broadcast %179 : vector<8x1xf32> to vector<8x8xf32>
    %181 = arith.subf %177, %180 : vector<8x8xf32>
    %182 = math.exp %181 : vector<8x8xf32>
    %cst_70 = arith.constant dense<0.000000e+00> : vector<8xf32>
    %183 = vector.multi_reduction <add>, %182, %cst_70 [1] : vector<8x8xf32> to vector<8xf32>
    %184 = vector.shape_cast %183 : vector<8xf32> to vector<8x1xf32>
    %185 = tpu.reciprocal %184 {approx = true} : vector<8x1xf32> -> vector<8x1xf32>
    %186 = vector.broadcast %185 : vector<8x1xf32> to vector<8x8xf32>
    %187 = arith.mulf %182, %186 : vector<8x8xf32>
    %188 = arith.truncf %187 : vector<8x8xf32> to vector<8x8xbf16>
    %cst_71 = arith.constant dense<0.000000e+00> : vector<8x8xf32>
    %189 = tpu.matmul %188, %176, %cst_71 {dimension_numbers = #tpu.dot_dimension_numbers<[1], [0], [0], [1], [0, 0, 1, 1], [], []>} : vector<8x8xbf16>, vector<8x8xbf16>, vector<8x8xf32> -> vector<8x8xf32>
    %c0_72 = arith.constant 0 : index
    %c8_73 = arith.constant 8 : index
    %190 = vector.load %arg22[%c0_72, %c8_73] : memref<8x32xf32, #tpu.memory_space<vmem>>, vector<8x8xf32>
    tpu.vector_store %arg22[%c0_72, %c8_73], %189 {strides = array<i32>} : memref<8x32xf32, #tpu.memory_space<vmem>>, vector<8x8xf32>,
    %191 = vector.extract_strided_slice %149 {offsets = [0, 16], sizes = [8, 8], strides = [1, 1]} : vector<8x32xf32> to vector<8x8xf32>
    %192 = arith.truncf %191 : vector<8x8xf32> to vector<8x8xbf16>
    %193 = vector.extract_strided_slice %150 {offsets = [0, 16], sizes = [8, 8], strides = [1, 1]} : vector<8x32xf32> to vector<8x8xf32>
    %194 = arith.truncf %193 : vector<8x8xf32> to vector<8x8xbf16>
    %195 = vector.extract_strided_slice %148 {offsets = [0, 16], sizes = [8, 8], strides = [1, 1]} : vector<8x32xf32> to vector<8x8xf32>
    %196 = arith.truncf %195 : vector<8x8xf32> to vector<8x8xbf16>
    %cst_74 = arith.constant dense<0.000000e+00> : vector<8x8xf32>
    %197 = tpu.matmul %192, %194, %cst_74 {dimension_numbers = #tpu.dot_dimension_numbers<[1], [1], [0], [0], [0, 0, 1, 0], [], []>} : vector<8x8xbf16>, vector<8x8xbf16>, vector<8x8xf32> -> vector<8x8xf32>
    %cst_75 = arith.constant dense<0xFF800000> : vector<8xf32>
    %198 = vector.multi_reduction <maximumf>, %197, %cst_75 [1] : vector<8x8xf32> to vector<8xf32>
    %199 = vector.shape_cast %198 : vector<8xf32> to vector<8x1xf32>
    %200 = vector.broadcast %199 : vector<8x1xf32> to vector<8x8xf32>
    %201 = arith.subf %197, %200 : vector<8x8xf32>
    %202 = math.exp %201 : vector<8x8xf32>
    %cst_76 = arith.constant dense<0.000000e+00> : vector<8xf32>
    %203 = vector.multi_reduction <add>, %202, %cst_76 [1] : vector<8x8xf32> to vector<8xf32>
    %204 = vector.shape_cast %203 : vector<8xf32> to vector<8x1xf32>
    %205 = tpu.reciprocal %204 {approx = true} : vector<8x1xf32> -> vector<8x1xf32>
    %206 = vector.broadcast %205 : vector<8x1xf32> to vector<8x8xf32>
    %207 = arith.mulf %202, %206 : vector<8x8xf32>
    %208 = arith.truncf %207 : vector<8x8xf32> to vector<8x8xbf16>
    %cst_77 = arith.constant dense<0.000000e+00> : vector<8x8xf32>
    %209 = tpu.matmul %208, %196, %cst_77 {dimension_numbers = #tpu.dot_dimension_numbers<[1], [0], [0], [1], [0, 0, 1, 1], [], []>} : vector<8x8xbf16>, vector<8x8xbf16>, vector<8x8xf32> -> vector<8x8xf32>
    %c0_78 = arith.constant 0 : index
    %c16_79 = arith.constant 16 : index
    %210 = vector.load %arg22[%c0_78, %c16_79] : memref<8x32xf32, #tpu.memory_space<vmem>>, vector<8x8xf32>
    tpu.vector_store %arg22[%c0_78, %c16_79], %209 {strides = array<i32>} : memref<8x32xf32, #tpu.memory_space<vmem>>, vector<8x8xf32>,
    %211 = vector.extract_strided_slice %149 {offsets = [0, 24], sizes = [8, 8], strides = [1, 1]} : vector<8x32xf32> to vector<8x8xf32>
    %212 = arith.truncf %211 : vector<8x8xf32> to vector<8x8xbf16>
    %213 = vector.extract_strided_slice %150 {offsets = [0, 24], sizes = [8, 8], strides = [1, 1]} : vector<8x32xf32> to vector<8x8xf32>
    %214 = arith.truncf %213 : vector<8x8xf32> to vector<8x8xbf16>
    %215 = vector.extract_strided_slice %148 {offsets = [0, 24], sizes = [8, 8], strides = [1, 1]} : vector<8x32xf32> to vector<8x8xf32>
    %216 = arith.truncf %215 : vector<8x8xf32> to vector<8x8xbf16>
    %cst_80 = arith.constant dense<0.000000e+00> : vector<8x8xf32>
    %217 = tpu.matmul %212, %214, %cst_80 {dimension_numbers = #tpu.dot_dimension_numbers<[1], [1], [0], [0], [0, 0, 1, 0], [], []>} : vector<8x8xbf16>, vector<8x8xbf16>, vector<8x8xf32> -> vector<8x8xf32>
    %cst_81 = arith.constant dense<0xFF800000> : vector<8xf32>
    %218 = vector.multi_reduction <maximumf>, %217, %cst_81 [1] : vector<8x8xf32> to vector<8xf32>
    %219 = vector.shape_cast %218 : vector<8xf32> to vector<8x1xf32>
    %220 = vector.broadcast %219 : vector<8x1xf32> to vector<8x8xf32>
    %221 = arith.subf %217, %220 : vector<8x8xf32>
    %222 = math.exp %221 : vector<8x8xf32>
    %cst_82 = arith.constant dense<0.000000e+00> : vector<8xf32>
    %223 = vector.multi_reduction <add>, %222, %cst_82 [1] : vector<8x8xf32> to vector<8xf32>
    %224 = vector.shape_cast %223 : vector<8xf32> to vector<8x1xf32>
    %225 = tpu.reciprocal %224 {approx = true} : vector<8x1xf32> -> vector<8x1xf32>
    %226 = vector.broadcast %225 : vector<8x1xf32> to vector<8x8xf32>
    %227 = arith.mulf %222, %226 : vector<8x8xf32>
    %228 = arith.truncf %227 : vector<8x8xf32> to vector<8x8xbf16>
    %cst_83 = arith.constant dense<0.000000e+00> : vector<8x8xf32>
    %229 = tpu.matmul %228, %216, %cst_83 {dimension_numbers = #tpu.dot_dimension_numbers<[1], [0], [0], [1], [0, 0, 1, 1], [], []>} : vector<8x8xbf16>, vector<8x8xbf16>, vector<8x8xf32> -> vector<8x8xf32>
    %c0_84 = arith.constant 0 : index
    %c24_85 = arith.constant 24 : index
    %230 = vector.load %arg22[%c0_84, %c24_85] : memref<8x32xf32, #tpu.memory_space<vmem>>, vector<8x8xf32>
    tpu.vector_store %arg22[%c0_84, %c24_85], %229 {strides = array<i32>} : memref<8x32xf32, #tpu.memory_space<vmem>>, vector<8x8xf32>,
    %c0_86 = arith.constant 0 : index
    %c0_87 = arith.constant 0 : index
    %231 = vector.load %arg22[%c0_86, %c0_87] : memref<8x32xf32, #tpu.memory_space<vmem>>, vector<8x32xf32>
    %232 = arith.truncf %231 : vector<8x32xf32> to vector<8x32xbf16>
    %c0_88 = arith.constant 0 : index
    %c0_89 = arith.constant 0 : index
    %c0_90 = arith.constant 0 : index
    %233 = vector.load %arg11[%c0_88, %c0_89, %c0_90] : memref<1x32x32xbf16, #tpu.memory_space<vmem>>, vector<1x32x32xbf16>
    %234 = vector.shape_cast %233 : vector<1x32x32xbf16> to vector<32x32xbf16>
    %cst_91 = arith.constant dense<0.000000e+00> : vector<8x32xf32>
    %235 = tpu.matmul %232, %234, %cst_91 {dimension_numbers = #tpu.dot_dimension_numbers<[1], [0], [0], [1], [0, 0, 1, 1], [], []>} : vector<8x32xbf16>, vector<32x32xbf16>, vector<8x32xf32> -> vector<8x32xf32>
    %c0_92 = arith.constant 0 : index
    %c0_93 = arith.constant 0 : index
    %c0_94 = arith.constant 0 : index
    %236 = vector.load %arg12[%c0_92, %c0_93, %c0_94] : memref<1x1x32xf32, #tpu.memory_space<vmem>>, vector<1x1x32xf32>
    %237 = vector.shape_cast %236 : vector<1x1x32xf32> to vector<1x32xf32>
    %238 = vector.broadcast %237 : vector<1x32xf32> to vector<8x32xf32>
    %239 = arith.addf %235, %238 : vector<8x32xf32>
    %240 = arith.addf %239, %140 : vector<8x32xf32>
    %c0_95 = arith.constant 0 : index
    %c0_96 = arith.constant 0 : index
    %c0_97 = arith.constant 0 : index
    %241 = vector.load %arg13[%c0_95, %c0_96, %c0_97] : memref<1x1x32xf32, #tpu.memory_space<vmem>>, vector<1x1x32xf32>
    %242 = vector.shape_cast %241 : vector<1x1x32xf32> to vector<1x32xf32>
    %c0_98 = arith.constant 0 : index
    %c0_99 = arith.constant 0 : index
    %c0_100 = arith.constant 0 : index
    %243 = vector.load %arg14[%c0_98, %c0_99, %c0_100] : memref<1x1x32xf32, #tpu.memory_space<vmem>>, vector<1x1x32xf32>
    %244 = vector.shape_cast %243 : vector<1x1x32xf32> to vector<1x32xf32>
    %cst_101 = arith.constant dense<0.000000e+00> : vector<8xf32>
    %245 = vector.multi_reduction <add>, %240, %cst_101 [1] : vector<8x32xf32> to vector<8xf32>
    %246 = vector.shape_cast %245 : vector<8xf32> to vector<8x1xf32>
    %cst_102 = arith.constant 3.200000e+01 : f32
    %247 = vector.broadcast %cst_102 : f32 to vector<8x1xf32>
    %248 = arith.divf %246, %247 : vector<8x1xf32>
    %249 = vector.broadcast %248 : vector<8x1xf32> to vector<8x32xf32>
    %250 = arith.subf %240, %249 : vector<8x32xf32>
    %251 = arith.mulf %250, %250 : vector<8x32xf32>
    %cst_103 = arith.constant dense<0.000000e+00> : vector<8xf32>
    %252 = vector.multi_reduction <add>, %251, %cst_103 [1] : vector<8x32xf32> to vector<8xf32>
    %253 = vector.shape_cast %252 : vector<8xf32> to vector<8x1xf32>
    %cst_104 = arith.constant 3.200000e+01 : f32
    %254 = vector.broadcast %cst_104 : f32 to vector<8x1xf32>
    %255 = arith.divf %253, %254 : vector<8x1xf32>
    %256 = vector.broadcast %248 : vector<8x1xf32> to vector<8x32xf32>
    %257 = arith.subf %240, %256 : vector<8x32xf32>
    %cst_105 = arith.constant 9.99999974E-6 : f32
    %258 = vector.broadcast %cst_105 : f32 to vector<8x1xf32>
    %259 = arith.addf %255, %258 : vector<8x1xf32>
    %260 = math.rsqrt %259 : vector<8x1xf32>
    %261 = vector.broadcast %260 : vector<8x1xf32> to vector<8x32xf32>
    %262 = arith.mulf %257, %261 : vector<8x32xf32>
    %263 = vector.broadcast %242 : vector<1x32xf32> to vector<8x32xf32>
    %264 = arith.mulf %262, %263 : vector<8x32xf32>
    %265 = vector.broadcast %244 : vector<1x32xf32> to vector<8x32xf32>
    %266 = arith.addf %264, %265 : vector<8x32xf32>
    %267 = arith.truncf %266 : vector<8x32xf32> to vector<8x32xbf16>
    %c0_106 = arith.constant 0 : index
    %c0_107 = arith.constant 0 : index
    %c0_108 = arith.constant 0 : index
    %268 = vector.load %arg15[%c0_106, %c0_107, %c0_108] : memref<1x32x128xbf16, #tpu.memory_space<vmem>>, vector<1x32x128xbf16>
    %269 = vector.shape_cast %268 : vector<1x32x128xbf16> to vector<32x128xbf16>
    %cst_109 = arith.constant dense<0.000000e+00> : vector<8x128xf32>
    %270 = tpu.matmul %267, %269, %cst_109 {dimension_numbers = #tpu.dot_dimension_numbers<[1], [0], [0], [1], [0, 0, 1, 1], [], []>} : vector<8x32xbf16>, vector<32x128xbf16>, vector<8x128xf32> -> vector<8x128xf32>
    %c0_110 = arith.constant 0 : index
    %c0_111 = arith.constant 0 : index
    %c0_112 = arith.constant 0 : index
    %271 = vector.load %arg16[%c0_110, %c0_111, %c0_112] : memref<1x1x128xf32, #tpu.memory_space<vmem>>, vector<1x1x128xf32>
    %272 = vector.shape_cast %271 : vector<1x1x128xf32> to vector<1x128xf32>
    %273 = vector.broadcast %272 : vector<1x128xf32> to vector<8x128xf32>
    %274 = arith.addf %270, %273 : vector<8x128xf32>
    %cst_113 = arith.constant 0.000000e+00 : f32
    %275 = vector.broadcast %cst_113 : f32 to vector<8x128xf32>
    %276 = arith.maximumf %274, %275 : vector<8x128xf32>
    %277 = arith.truncf %276 : vector<8x128xf32> to vector<8x128xbf16>
    %c0_114 = arith.constant 0 : index
    %c0_115 = arith.constant 0 : index
    %c0_116 = arith.constant 0 : index
    %278 = vector.load %arg17[%c0_114, %c0_115, %c0_116] : memref<1x128x32xbf16, #tpu.memory_space<vmem>>, vector<1x128x32xbf16>
    %279 = vector.shape_cast %278 : vector<1x128x32xbf16> to vector<128x32xbf16>
    %cst_117 = arith.constant dense<0.000000e+00> : vector<8x32xf32>
    %280 = tpu.matmul %277, %279, %cst_117 {dimension_numbers = #tpu.dot_dimension_numbers<[1], [0], [0], [1], [0, 0, 1, 1], [], []>} : vector<8x128xbf16>, vector<128x32xbf16>, vector<8x32xf32> -> vector<8x32xf32>
    %c0_118 = arith.constant 0 : index
    %c0_119 = arith.constant 0 : index
    %c0_120 = arith.constant 0 : index
    %281 = vector.load %arg18[%c0_118, %c0_119, %c0_120] : memref<1x1x32xf32, #tpu.memory_space<vmem>>, vector<1x1x32xf32>
    %282 = vector.shape_cast %281 : vector<1x1x32xf32> to vector<1x32xf32>
    %283 = vector.broadcast %282 : vector<1x32xf32> to vector<8x32xf32>
    %284 = arith.addf %280, %283 : vector<8x32xf32>
    %285 = arith.addf %284, %266 : vector<8x32xf32>
    %c0_121 = arith.constant 0 : index
    %c0_122 = arith.constant 0 : index
    %c0_123 = arith.constant 0 : index
    %286 = vector.load %arg19[%c0_121, %c0_122, %c0_123] : memref<1x1x32xf32, #tpu.memory_space<vmem>>, vector<1x1x32xf32>
    %287 = vector.shape_cast %286 : vector<1x1x32xf32> to vector<1x32xf32>
    %c0_124 = arith.constant 0 : index
    %c0_125 = arith.constant 0 : index
    %c0_126 = arith.constant 0 : index
    %288 = vector.load %arg20[%c0_124, %c0_125, %c0_126] : memref<1x1x32xf32, #tpu.memory_space<vmem>>, vector<1x1x32xf32>
    %289 = vector.shape_cast %288 : vector<1x1x32xf32> to vector<1x32xf32>
    %cst_127 = arith.constant dense<0.000000e+00> : vector<8xf32>
    %290 = vector.multi_reduction <add>, %285, %cst_127 [1] : vector<8x32xf32> to vector<8xf32>
    %291 = vector.shape_cast %290 : vector<8xf32> to vector<8x1xf32>
    %cst_128 = arith.constant 3.200000e+01 : f32
    %292 = vector.broadcast %cst_128 : f32 to vector<8x1xf32>
    %293 = arith.divf %291, %292 : vector<8x1xf32>
    %294 = vector.broadcast %293 : vector<8x1xf32> to vector<8x32xf32>
    %295 = arith.subf %285, %294 : vector<8x32xf32>
    %296 = arith.mulf %295, %295 : vector<8x32xf32>
    %cst_129 = arith.constant dense<0.000000e+00> : vector<8xf32>
    %297 = vector.multi_reduction <add>, %296, %cst_129 [1] : vector<8x32xf32> to vector<8xf32>
    %298 = vector.shape_cast %297 : vector<8xf32> to vector<8x1xf32>
    %cst_130 = arith.constant 3.200000e+01 : f32
    %299 = vector.broadcast %cst_130 : f32 to vector<8x1xf32>
    %300 = arith.divf %298, %299 : vector<8x1xf32>
    %301 = vector.broadcast %293 : vector<8x1xf32> to vector<8x32xf32>
    %302 = arith.subf %285, %301 : vector<8x32xf32>
    %cst_131 = arith.constant 9.99999974E-6 : f32
    %303 = vector.broadcast %cst_131 : f32 to vector<8x1xf32>
    %304 = arith.addf %300, %303 : vector<8x1xf32>
    %305 = math.rsqrt %304 : vector<8x1xf32>
    %306 = vector.broadcast %305 : vector<8x1xf32> to vector<8x32xf32>
    %307 = arith.mulf %302, %306 : vector<8x32xf32>
    %308 = vector.broadcast %287 : vector<1x32xf32> to vector<8x32xf32>
    %309 = arith.mulf %307, %308 : vector<8x32xf32>
    %310 = vector.broadcast %289 : vector<1x32xf32> to vector<8x32xf32>
    %311 = arith.addf %309, %310 : vector<8x32xf32>
    %c0_132 = arith.constant 0 : index
    %c0_133 = arith.constant 0 : index
    %c0_134 = arith.constant 0 : index
    %312 = vector.load %arg21[%c0_132, %c0_133, %c0_134] : memref<1x8x32xf32, #tpu.memory_space<vmem>>, vector<1x8x32xf32>
    %313 = vector.shape_cast %312 : vector<1x8x32xf32> to vector<8x32xf32>
    %314 = vector.shape_cast %311 : vector<8x32xf32> to vector<1x8x32xf32>
    tpu.vector_store %arg21[%c0_132, %c0_133, %c0_134], %314 {strides = array<i32>} : memref<1x8x32xf32, #tpu.memory_space<vmem>>, vector<1x8x32xf32>,
    return
  }
  func.func @transform_0(%arg0: i32, %arg1: i32) -> (i32, i32, i32) {
    %c0_i32 = arith.constant 0 : i32
    %c0_i32_0 = arith.constant 0 : i32
    %c0_i32_1 = arith.constant 0 : i32
    return %arg0, %c0_i32, %c0_i32_0 : i32, i32, i32
  }
  func.func @transform_1(%arg0: i32, %arg1: i32) -> (i32, i32, i32) {
    %c0_i32 = arith.constant 0 : i32
    %c0_i32_0 = arith.constant 0 : i32
    %c0_i32_1 = arith.constant 0 : i32
    return %arg0, %c0_i32, %c0_i32_0 : i32, i32, i32
  }
  func.func @transform_2(%arg0: i32, %arg1: i32) -> (i32, i32, i32) {
    %c0_i32 = arith.constant 0 : i32
    %c0_i32_0 = arith.constant 0 : i32
    %c0_i32_1 = arith.constant 0 : i32
    return %arg1, %c0_i32, %c0_i32_0 : i32, i32, i32
  }
  func.func @transform_3(%arg0: i32, %arg1: i32) -> (i32, i32, i32) {
    %c0_i32 = arith.constant 0 : i32
    %c0_i32_0 = arith.constant 0 : i32
    %c0_i32_1 = arith.constant 0 : i32
    return %arg1, %c0_i32, %c0_i32_0 : i32, i32, i32
  }
  func.func @transform_4(%arg0: i32, %arg1: i32) -> (i32, i32, i32) {
    %c0_i32 = arith.constant 0 : i32
    %c0_i32_0 = arith.constant 0 : i32
    %c0_i32_1 = arith.constant 0 : i32
    return %arg1, %c0_i32, %c0_i32_0 : i32, i32, i32
  }
  func.func @transform_5(%arg0: i32, %arg1: i32) -> (i32, i32, i32) {
    %c0_i32 = arith.constant 0 : i32
    %c0_i32_0 = arith.constant 0 : i32
    %c0_i32_1 = arith.constant 0 : i32
    return %arg1, %c0_i32, %c0_i32_0 : i32, i32, i32
  }
  func.func @transform_6(%arg0: i32, %arg1: i32) -> (i32, i32, i32) {
    %c0_i32 = arith.constant 0 : i32
    %c0_i32_0 = arith.constant 0 : i32
    %c0_i32_1 = arith.constant 0 : i32
    return %arg1, %c0_i32, %c0_i32_0 : i32, i32, i32
  }
  func.func @transform_7(%arg0: i32, %arg1: i32) -> (i32, i32, i32) {
    %c0_i32 = arith.constant 0 : i32
    %c0_i32_0 = arith.constant 0 : i32
    %c0_i32_1 = arith.constant 0 : i32
    return %arg1, %c0_i32, %c0_i32_0 : i32, i32, i32
  }
  func.func @transform_8(%arg0: i32, %arg1: i32) -> (i32, i32, i32) {
    %c0_i32 = arith.constant 0 : i32
    %c0_i32_0 = arith.constant 0 : i32
    %c0_i32_1 = arith.constant 0 : i32
    return %arg1, %c0_i32, %c0_i32_0 : i32, i32, i32
  }
  func.func @transform_9(%arg0: i32, %arg1: i32) -> (i32, i32, i32) {
    %c0_i32 = arith.constant 0 : i32
    %c0_i32_0 = arith.constant 0 : i32
    %c0_i32_1 = arith.constant 0 : i32
    return %arg1, %c0_i32, %c0_i32_0 : i32, i32, i32
  }
  func.func @transform_10(%arg0: i32, %arg1: i32) -> (i32, i32, i32) {
    %c0_i32 = arith.constant 0 : i32
    %c0_i32_0 = arith.constant 0 : i32
    %c0_i32_1 = arith.constant 0 : i32
    return %arg1, %c0_i32, %c0_i32_0 : i32, i32, i32
  }
  func.func @transform_11(%arg0: i32, %arg1: i32) -> (i32, i32, i32) {
    %c0_i32 = arith.constant 0 : i32
    %c0_i32_0 = arith.constant 0 : i32
    %c0_i32_1 = arith.constant 0 : i32
    return %arg1, %c0_i32, %c0_i32_0 : i32, i32, i32
  }
  func.func @transform_12(%arg0: i32, %arg1: i32) -> (i32, i32, i32) {
    %c0_i32 = arith.constant 0 : i32
    %c0_i32_0 = arith.constant 0 : i32
    %c0_i32_1 = arith.constant 0 : i32
    return %arg1, %c0_i32, %c0_i32_0 : i32, i32, i32
  }
  func.func @transform_13(%arg0: i32, %arg1: i32) -> (i32, i32, i32) {
    %c0_i32 = arith.constant 0 : i32
    %c0_i32_0 = arith.constant 0 : i32
    %c0_i32_1 = arith.constant 0 : i32
    return %arg1, %c0_i32, %c0_i32_0 : i32, i32, i32
  }
  func.func @transform_14(%arg0: i32, %arg1: i32) -> (i32, i32, i32) {
    %c0_i32 = arith.constant 0 : i32
    %c0_i32_0 = arith.constant 0 : i32
    %c0_i32_1 = arith.constant 0 : i32
    return %arg1, %c0_i32, %c0_i32_0 : i32, i32, i32
  }
  func.func @transform_15(%arg0: i32, %arg1: i32) -> (i32, i32, i32) {
    %c0_i32 = arith.constant 0 : i32
    %c0_i32_0 = arith.constant 0 : i32
    %c0_i32_1 = arith.constant 0 : i32
    return %arg1, %c0_i32, %c0_i32_0 : i32, i32, i32
  }
  func.func @transform_16(%arg0: i32, %arg1: i32) -> (i32, i32, i32) {
    %c0_i32 = arith.constant 0 : i32
    %c0_i32_0 = arith.constant 0 : i32
    %c0_i32_1 = arith.constant 0 : i32
    return %arg1, %c0_i32, %c0_i32_0 : i32, i32, i32
  }
  func.func @transform_17(%arg0: i32, %arg1: i32) -> (i32, i32, i32) {
    %c0_i32 = arith.constant 0 : i32
    %c0_i32_0 = arith.constant 0 : i32
    %c0_i32_1 = arith.constant 0 : i32
    return %arg1, %c0_i32, %c0_i32_0 : i32, i32, i32
  }
  func.func @transform_18(%arg0: i32, %arg1: i32) -> (i32, i32, i32) {
    %c0_i32 = arith.constant 0 : i32
    %c0_i32_0 = arith.constant 0 : i32
    %c0_i32_1 = arith.constant 0 : i32
    return %arg1, %c0_i32, %c0_i32_0 : i32, i32, i32
  }
  func.func @transform_19(%arg0: i32, %arg1: i32) -> (i32, i32, i32) {
    %c0_i32 = arith.constant 0 : i32
    %c0_i32_0 = arith.constant 0 : i32
    %c0_i32_1 = arith.constant 0 : i32
    return %arg0, %c0_i32, %c0_i32_0 : i32, i32, i32
  }
}

</mosaic_0001>

<bundles_post_ra>
// kernel: tpu_custom_call.1
= control target key start
LH: loop header
LB: loop body
LE: loop exit
PB: predicated region body
PF: predicated region fallthrough
CT: control target
= control target key end

     0   :  { %s4376_s0 = inlined_call_operand.hbm [shape: f32[2,8,32], index: 0, kind: input, shape index: {}]   ;;  %s4377_s1 = inlined_call_operand.hbm [shape: f32[2,8,32], index: 1, kind: input, shape index: {}]   ;;  %s4378_s2 = inlined_call_operand.vmem [shape: bf16[2,32,96], index: 2, kind: input, shape index: {}]   ;;  %s4379_s3 = inlined_call_operand.vmem [shape: bf16[2,32,32], index: 3, kind: input, shape index: {}]   ;;  %s4380_s4 = inlined_call_operand.vmem [shape: f32[2,1,32], index: 4, kind: input, shape index: {}]   ;;  %s4381_s5 = inlined_call_operand.vmem [shape: f32[2,1,32], index: 5, kind: input, shape index: {}]   ;;  %s4382_s6 = inlined_call_operand.vmem [shape: f32[2,1,32], index: 6, kind: input, shape index: {}]   ;;  %s4383_s7 = inlined_call_operand.vmem [shape: bf16[2,32,64], index: 7, kind: input, shape index: {}]   ;;  %s4384_s8 = inlined_call_operand.vmem [shape: bf16[2,32,32], index: 8, kind: input, shape index: {}]   ;;  %s4385_s9 = inlined_call_operand.vmem [shape: bf16[2,32,32], index: 9, kind: input, shape index: {}]   ;;  %s4386_s10 = inlined_call_operand.vmem [shape: f32[2,1,32], index: 10, kind: input, shape index: {}]   ;;  %s4387_s11 = inlined_call_operand.vmem [shape: f32[2,1,32], index: 11, kind: input, shape index: {}]   ;;  %s4388_s12 = inlined_call_operand.vmem [shape: f32[2,1,32], index: 12, kind: input, shape index: {}]   ;;  %s4389_s13 = inlined_call_operand.hbm [shape: bf16[2,32,128], index: 13, kind: input, shape index: {}]   ;;  %s4390_s14 = inlined_call_operand.vmem [shape: f32[2,1,128], index: 14, kind: input, shape index: {}]   ;;  %s4391_s15 = inlined_call_operand.vmem [shape: bf16[2,128,32], index: 15, kind: input, shape index: {}]   ;;  %s4392_s16 = inlined_call_operand.vmem [shape: f32[2,1,32], index: 16, kind: input, shape index: {}]   ;;  %s4393_s17 = inlined_call_operand.vmem [shape: f32[2,1,32], index: 17, kind: input, shape index: {}]   ;;  %s4394_s18 = inlined_call_operand.vmem [shape: f32[2,1,32], index: 18, kind: input, shape index: {}]   ;;  %s4395_s19 = inlined_call_operand.hbm [shape: f32[2,8,32], index: 19, kind: output, shape index: {}]  }
   0x1   :  { %4424 = sst [smem:[#allocation31_spill]] %s4376_s0 }
   0x2   :  { %4425 = sst [smem:[#allocation32_spill]] %s4377_s1 }
   0x3   :  { %4426 = sst [smem:[#allocation33_spill]] %s4378_s2 }
   0x4   :  { %4427 = sst [smem:[#allocation34_spill]] %s4379_s3 }
   0x5   :  { %4428 = sst [smem:[#allocation35_spill]] %s4382_s6 }
   0x6   :  { %4429 = sst [smem:[#allocation36_spill]] %s4383_s7 }
   0x7   :  { %4430 = sst [smem:[#allocation37_spill]] %s4384_s8 }
   0x8   :  { %4431 = sst [smem:[#allocation38_spill]] %s4385_s9 }
   0x9   :  { %4432 = sst [smem:[#allocation39_spill]] %s4386_s10 }
   0xa   :  { %4433 = sst [smem:[#allocation40_spill]] %s4387_s11 }
   0xb   :  { %4434 = sst [smem:[#allocation41_spill]] %s4388_s12 }
   0xc   :  { %4435 = sst [smem:[#allocation42_spill]] %s4389_s13 }
   0xd   :  { %4436 = sst [smem:[#allocation43_spill]] %s4390_s14 }
   0xe   :  { %4437 = sst [smem:[#allocation44_spill]] %s4391_s15 }
   0xf   :  { %4438 = sst [smem:[#allocation45_spill]] %s4392_s16 }
  0x10   :  { %4439 = sst [smem:[#allocation46_spill]] %s4393_s17 }
  0x11   :  { %4440 = sst [smem:[#allocation47_spill]] %s4394_s18 }
  0x12   :  { %4441 = sst [smem:[#allocation48_spill]] %s4395_s19 }
  0x13   :  { %24 = vsyncpa [#allocation4], 0 }
  0x14   :  { %26 = vsyncpa [#allocation4 + $0x1], 0 }
  0x15   :  { %27 = vsyncpa [#allocation7], 0 }
  0x16   :  { %29 = vsyncpa [#allocation7 + $0x1], 0 }
  0x17   :  { %30 = vsyncpa [#allocation5], 0 }
  0x18   :  { %32 = vsyncpa [#allocation5 + $0x1], 0  ;;  %s3636_s0 = smov 0   ;;  %s3638_s30 = smov 0  }
  0x19   :  { %s3640_s20 = smov 0   ;;  %s3642_s21 = smov 0  }
  0x1a   :  { %s3644_s1 = smov 0   ;;  %s3646_s22 = smov 0  }
  0x1b   :  { %s3648_s2 = smov 0   ;;  %s3650_s23 = smov 0  }
  0x1c   :  { %s3652_s24 = smov 0   ;;  %s3654_s25 = smov 0  }
  0x1d   :  { %s3656_s3 = smov 0  }
  0x1e LB: > { %4442 = sst [smem:[#allocation14_spill]] %s3476_s30  ;;  %s3692_s26 = sadd.s32 4294967295, %s3512_s3   ;;  %s3512_s3 = sphi %s3656_s3, %s38_s3   ;;  %s3508_s25 = sphi %s3654_s25, %s4530_s25   ;;  %s3504_s24 = sphi %s3652_s24, %s4529_s24   ;;  %s3500_s23 = sphi %s3650_s23, %s4528_s23   ;;  %s3496_s2 = sphi %s3648_s2, %s4527_s2   ;;  %s3492_s22 = sphi %s3646_s22, %s4526_s22   ;;  %s3488_s1 = sphi %s3644_s1, %s4525_s1   ;;  %s3484_s21 = sphi %s3642_s21, %s4524_s21   ;;  %s3480_s20 = sphi %s3640_s20, %s4523_s20   ;;  %s3476_s30 = sphi %s3638_s30, %s4522_s30   ;;  %s3472_s0 = sphi %s3636_s0, %s4521_s0  }
  0x1f   : > { %4443 = sst [smem:[#allocation15_spill]] %s3480_s20  ;;  %s2790_s27 = sadd.s32 4294967294, %s3512_s3  }
  0x20   : > { %4444 = sst [smem:[#allocation16_spill]] %s3484_s21  ;;  %s47_s28 = sadd.s32 1, %s3504_s24 }
  0x21   : > { %4445 = sst [smem:[#allocation17_spill]] %s3488_s1  ;;  %s50_s29 = sadd.s32 1, %s3508_s25 }
  0x22   : > { %4446 = sst [smem:[#allocation18_spill]] %s3492_s22  ;;  %p48_p0 = scmp.ge.s32.totalorder %s47_s28, 2 }
  0x23   : > { %4447 = sst [smem:[#allocation19_spill]] %s3500_s23  ;;  %s57_s19 = sadd.s32 1, %s3492_s22 }
  0x24   : > { %4448 = sst [smem:[#allocation20_spill]] %s3504_s24  ;;  %p64_p1 = scmp.ne.s32.totalorder %s3492_s22, %s3488_s1 }
  0x25   : > { %4449 = sst [smem:[#allocation21_spill]] %s3508_s25  ;;  %p65_p2 = scmp.eq.s32.totalorder %s3512_s3, 0 }
  0x26   : > { %4450 = sst [smem:[#allocation22_spill]] %s3512_s3  ;;  %s4532_s28 = smov (%p48_p0, %s47_s28), 0 }
  0x27   : > { %4451 = sst [smem:[#allocation23_spill]] %s4532_s28  ;;  %s4534_s29 = smov (!%p48_p0, %s50_s29), %s3508_s25 }
  0x28   : > { %p3709_p3 = por %p65_p2, %p64_p1  ;;  %p4400_p4 = scmp.ne.s32.totalorder %s3488_s1, %s3484_s21 }
  0x29   : > { %p52_p5 = scmp.ge.s32.totalorder %s4534_s29, 2  ;;  %p71_p6 = scmp.eq.s32.totalorder %s3692_s26, 0 }
  0x2a   : > { %s392_s18 = ssub.s32 %s3504_s24, %s4532_s28  ;;  %s395_s17 = sadd.s32 1, %s3480_s20 }
  0x2b   : > { %s4536_s29 = smov (%p52_p5, %s4534_s29), 0  ;;  %p3726_p7 = por %p71_p6, %p4400_p4 }
  0x2c   : > { %4453 = sst [smem:[#allocation24_spill]] %s4536_s29  ;;  %p393_p8 = scmp.eq.s32.totalorder %s392_s18, 0 }
  0x2d   : > { %s4454_s16 = scalar_select %p3726_p7, 1, 0 }
  0x2e   : > { %s54_s15 = ssub.s32 %s3508_s25, %s4536_s29  ;;  %p402_p9 = scmp.ne.s32.totalorder %s3480_s20, %s3476_s30 }
  0x2f   : > { %p55_p10 = scmp.eq.s32.totalorder %s54_s15, 0  ;;  %p408_p11 = scmp.ne.s32.totalorder %s3476_s30, %s3472_s0 }
  0x30   : > { %s3737_s28 = scalar_select %p393_p8, %s3480_s20, %s395_s17  }
  0x31   : > { %s3740_s14 = scalar_select %p55_p10, %s3492_s22, %s57_s19  }
  0x32   : > { %4455 = sst [smem:[#allocation25_spill]] %s3737_s28  ;;  %p3744_p12 = por %p402_p9, %p65_p2 }
  0x33   : > { %4456 = sst [smem:[#allocation26_spill]] %s3740_s14  ;;  %p3750_p13 = por %p408_p11, %p71_p6 }
  0x34   : > { %p562_p0 = scmp.eq.s32.totalorder %s3692_s26, 3  ;;  %p568_p5 = scmp.eq.s32.totalorder %s2790_s27, 3 }
  0x35   : > { %s4458_s18 = scalar_select %p3750_p13, 1, 0 }
  0x36   : > { %p3126_p4 = scmp.lt.s32.totalorder %s3512_s3, 4  ;;  %p3759_p7 = por %p562_p0, %p64_p1 }
  0x37   : > { %p4461_p8 = scmp.ne.s32.totalorder %s3488_s1, %s3484_s21  ;;  %s4406_s19 = sand.u32 1, %s3492_s22  }
  0x38   : > { %s4459_s15 = scalar_select %p3759_p7, 1, 0 }
  0x39   : > { %p3766_p10 = por %p568_p5, %p4461_p8  ;;  %s4408_s0 = sshll.u32 %s3508_s25, 7 }
  0x3a   : > { %4460 = sst [smem:[#allocation27_spill]] %s4459_s15  ;;  %s3774_s29 = sshll.u32 %s4406_s19, 3 }
  0x3b   : > { %s4462_s17 = scalar_select %p3766_p10, 1, 0 }
  0x3c   : > { %p3778_p2 = pnand %p3126_p4, %p3709_p3  ;;  %s606_s14 = sand.u32 1, %s3512_s3  }
  0x3d   : > { %4463 = sst [smem:[#allocation28_spill]] %s4462_s17  ;;  %s4465_s15 = sld [smem:[#allocation32_spill]] }
  0x3e   : > { %s610_s19 = scalar_lea.vmem [#allocation6], %s3774_s29  ;;  %p3795_p1 = pnand %p3126_p4, %p3744_p12 }
  0x3f   : > { %s617_s23 = sshll.u32 %s610_s19, 4  ;;  %s3799_s10 = scalar_lea.sflag [#allocation7], %s606_s14  ;;  %s3791_s23 = int_to_ptr.vmem [resolvable:$true] %s617_s23 }
  0x40   : > { %p3294_p6 = pneg %p3778_p2 }
  0x43   : > { %s3788_s11 = scalar_lea.hbm %s4465_s15, %s4408_s0  ;;  %s3297_s19 = scalar_lea.hbm %s4465_s15, 256 }
  0x44   : > { %s3292_s9 = scalar_lea.hbm %s3788_s11, 128  ;;  %p3298_p4 = scmp.lt.u32.totalorder %s3788_s11, %s4465_s15 }
  0x45   : > { %p3293_p3 = scmp.ne.s32.totalorder %s3788_s11, %s3292_s9  ;;  %p3299_p12 = scmp.lt.u32.totalorder %s3297_s19, %s3292_s9 }
  0x46   : > { %p3301_p5 = scmp.lt.u32.totalorder %s3292_s9, %s3788_s11 }
  0x47   : > { %p3295_p9 = pnand %p3294_p6, %p3293_p3  ;;  %p3300_p0 = por %p3299_p12, %p3298_p4 }
  0x49   : > { %p3296_p11 = pneg %p3295_p9  ;;  %p3302_p8 = por %p3301_p5, %p3300_p0 }
  0x4b   : > { %p3303_p10 = pnand %p3302_p8, %p3296_p11 }
  0x4d   : > { %3306 = shalt.err (!%p3303_p10)
}
  0x4e   : > { %s3307_s14 = scalar_lea.vmem %s3791_s23, 128  ;;  %s3514_s21 = smov [#allocation6]  }
  0x4f   : > { %p3308_p3 = scmp.ne.s32.totalorder %s3791_s23, %s3307_s14  ;;  %s3312_s28 = sshll.u32 %s3514_s21, 4  ;;  %s3313_s28 = int_to_ptr.vmem [resolvable:$false] %s3312_s28 }
  0x50   : > { %s3314_s0 = scalar_lea.vmem %s3313_s28, 256  ;;  %p3315_p13 = scmp.lt.s32.totalorder %s3791_s23, %s3313_s28 }
  0x51   : > { %p3310_p9 = pnand %p3308_p3, %p3294_p6  ;;  %p3316_p4 = scmp.lt.s32.totalorder %s3314_s0, %s3307_s14 }
  0x53   : > { %p3311_p7 = pneg %p3310_p9  ;;  %p3317_p12 = por %p3316_p4, %p3315_p13 }
  0x55   : > { %p3318_p0 = pnand %p3317_p12, %p3311_p7 }
  0x57   : > { %3321 = shalt.err (!%p3318_p0)
}
  0x58   : > { %3118 = dma.hbm_to_vmem [thread:$0]  (!%p3778_p2), %s3788_s11, 128, %s3791_s23, %s3799_s10  }
  0x59   : > { %p2800_p10 = scmp.ge.s32.totalorder %s3512_s3, 1  ;;  %p751_p11 = scmp.lt.s32.totalorder %s3512_s3, 5 }
  0x5a   : > { %s4468_s19 = sshll.u32 %s3508_s25, 7  ;;  %s4469_s21 = sld [smem:[#allocation31_spill]] }
  0x5b   : > { %p3829_p5 = pnand %p2800_p10, %p751_p11  ;;  %s592_s15 = scalar_lea.vmem [#allocation3], %s3774_s29 }
  0x5c   : > { %s599_s8 = sshll.u32 %s592_s15, 4  ;;  %s702_s11 = sand.u32 1, %s3480_s20   ;;  %s3841_s8 = int_to_ptr.vmem [resolvable:$true] %s599_s8 }
  0x5d   : > { %s4467_s9 = scalar_select %p3829_p5, 1, 0 }
  0x5e   : > { %s4471_s23 = sand.u32 1, %s3492_s22  }
  0x5f   : > { %s589_s3 = scalar_lea.sflag [#allocation4], %s4471_s23 }
  0x60   : > { %s4470_s28 = smov %s4469_s21  ;;  %s3838_s0 = scalar_lea.hbm %s4469_s21, %s4468_s19 }
  0x61   : > { %s3322_s7 = scalar_lea.hbm %s3838_s0, 128  ;;  %s3327_s14 = scalar_lea.hbm %s4470_s28, 256 }
  0x62   : > { %p3323_p7 = scmp.ne.s32.totalorder %s3838_s0, %s3322_s7  ;;  %p3328_p3 = scmp.lt.u32.totalorder %s3838_s0, %s4470_s28 }
  0x63   : > { %p3329_p9 = scmp.lt.u32.totalorder %s3327_s14, %s3322_s7  ;;  %p3331_p12 = scmp.lt.u32.totalorder %s3322_s7, %s3838_s0 }
  0x64   : > { %p3325_p13 = pnand %p3323_p7, %p3294_p6 }
  0x65   : > { %p3330_p4 = por %p3329_p9, %p3328_p3 }
  0x66   : > { %p3326_p8 = pneg %p3325_p13 }
  0x67   : > { %p3332_p0 = por %p3331_p12, %p3330_p4 }
  0x69   : > { %p3333_p10 = pnand %p3332_p0, %p3326_p8 }
  0x6b   : > { %3336 = shalt.err (!%p3333_p10)
}
  0x6c   : > { %s3337_s29 = scalar_lea.vmem %s3841_s8, 128  ;;  %s3515_s15 = smov [#allocation3]  }
  0x6d   : > { %p3338_p11 = scmp.ne.s32.totalorder %s3841_s8, %s3337_s29  ;;  %s3342_s23 = sshll.u32 %s3515_s15, 4  ;;  %s3343_s23 = int_to_ptr.vmem [resolvable:$false] %s3342_s23 }
  0x6e   : > { %s3344_s25 = scalar_lea.vmem %s3343_s23, 256  ;;  %p3345_p5 = scmp.lt.s32.totalorder %s3841_s8, %s3343_s23 }
  0x6f   : > { %p3340_p7 = pnand %p3338_p11, %p3294_p6  ;;  %p3346_p3 = scmp.lt.s32.totalorder %s3344_s25, %s3337_s29 }
  0x71   : > { %p3341_p13 = pneg %p3340_p7  ;;  %p3347_p9 = por %p3346_p3, %p3345_p5 }
  0x73   : > { %p3348_p4 = pnand %p3347_p9, %p3341_p13 }
  0x75   : > { %3351 = shalt.err (!%p3348_p4)
}
  0x76   : > { %3115 = dma.hbm_to_vmem [thread:$0]  (!%p3778_p2), %s3838_s0, 128, %s3841_s8, %s589_s3  }
  0x77   : > { %s2797_s7 = sshll.u32 %s702_s11, 4  ;;  %s2874_s12 = sshll.u32 %s3504_s24, 8 }
  0x78   : > { %s4472_s13 = sld [smem:[#allocation42_spill]]  ;;  %s704_s27 = scalar_lea.vmem [#allocation8], %s2797_s7 }
  0x79   : > { %s711_s29 = sshll.u32 %s704_s27, 4  ;;  %p3354_p2 = pneg %p3795_p1  ;;  %s3877_s29 = int_to_ptr.vmem [resolvable:$true] %s711_s29 }
  0x7e   : > { %s3875_s21 = scalar_lea.hbm %s4472_s13, %s2874_s12  ;;  %s3357_s0 = scalar_lea.hbm %s4472_s13, 512 }
  0x7f   : > { %s3352_s15 = scalar_lea.hbm %s3875_s21, 256  ;;  %p3358_p12 = scmp.lt.u32.totalorder %s3875_s21, %s4472_s13 }
  0x80   : > { %p3353_p6 = scmp.ne.s32.totalorder %s3875_s21, %s3352_s15  ;;  %p3359_p0 = scmp.lt.u32.totalorder %s3357_s0, %s3352_s15 }
  0x81   : > { %p3361_p11 = scmp.lt.u32.totalorder %s3352_s15, %s3875_s21 }
  0x82   : > { %p3355_p5 = pnand %p3354_p2, %p3353_p6  ;;  %p3360_p10 = por %p3359_p0, %p3358_p12 }
  0x84   : > { %p3356_p8 = pneg %p3355_p5  ;;  %p3362_p7 = por %p3361_p11, %p3360_p10 }
  0x86   : > { %p3363_p13 = pnand %p3362_p7, %p3356_p8 }
  0x88   : > { %3366 = shalt.err (!%p3363_p13)
}
  0x89   : > { %s3367_s25 = scalar_lea.vmem %s3877_s29, 256  ;;  %s3516_s7 = smov [#allocation8]  }
  0x8a   : > { %p3368_p3 = scmp.ne.s32.totalorder %s3877_s29, %s3367_s25  ;;  %s3372_s12 = sshll.u32 %s3516_s7, 4  ;;  %s3373_s12 = int_to_ptr.vmem [resolvable:$false] %s3372_s12 }
  0x8b   : > { %s3374_s19 = scalar_lea.vmem %s3373_s12, 512  ;;  %p3375_p6 = scmp.lt.s32.totalorder %s3877_s29, %s3373_s12 }
  0x8c   : > { %p3370_p9 = pnand %p3368_p3, %p3354_p2  ;;  %p3376_p5 = scmp.lt.s32.totalorder %s3374_s19, %s3367_s25 }
  0x8e   : > { %p3371_p4 = pneg %p3370_p9  ;;  %p3377_p12 = por %p3376_p5, %p3375_p6 }
  0x90   : > { %p3378_p0 = pnand %p3377_p12, %p3371_p4 }
  0x92   : > { %3381 = shalt.err (!%p3378_p0)
}
  0x93   : > { %s3517_s14 = smov 64   ;;  %s3518_s27 = smov 4  }
  0x94   : > { %3121 = dma.hbm_to_vmem [thread:$0]  (!%p3795_p1), %s3875_s21, 256, %s3877_s29, %s3799_s10, %s3517_s14, %s3517_s14, %s3518_s27  }
  0x95   : > { %p4473_p2 = scmp.ne.s32.totalorder %s4467_s9, 0 }
  0x97   : > { %755 = sbr.rel (%p4473_p2) target bundleno = 4507 (0x119b), region = 96 }
  0x9e   : > { %s3908_s15 = sand.u32 1, %s3488_s1   ;;  %p4475_p8 = scmp.ne.s32.totalorder %s4454_s16, 0 }
  0x9f   : > { %4474 = sst [smem:[#allocation29_spill]] %s3908_s15  ;;  %s3911_s8 = sshll.u32 %s3908_s15, 3 }
  0xa0   : > { %s758_s3 = scalar_lea.sflag [#allocation4], %s3908_s15 }
  0xa1   : > { %3455 = dma.done.wait (%p4475_p8), %s758_s3, 128  }
  0xa2   : > { %3457 = vsyncadd (%p4475_p8), %s758_s3, 4294967168  ;;  %s766_s10 = sand.u32 1, %s3692_s26  }
  0xa3   : > { %s767_s17 = scalar_lea.sflag [#allocation7], %s766_s10 }
  0xa4   : > { %3459 = dma.done.wait (%p4475_p8), %s767_s17, 128  }
  0xa5   : > { %3461 = vsyncadd (%p4475_p8), %s767_s17, 4294967168  ;;  %s777_s21 = sand.u32 1, %s3476_s30   ;;  %p4477_p1 = scmp.ne.s32.totalorder %s4458_s18, 0 }
  0xa6   : > { %s3926_s29 = sshll.u32 %s777_s21, 4 }
  0xa7   : > { %4476 = sst [smem:[#allocation30_spill]] %s3926_s29 }
  0xa8   : > { %3463 = dma.done.wait (%p4477_p1), %s767_s17, 256  }
  0xa9   : > { %3465 = vsyncadd (%p4477_p1), %s767_s17, 4294967040  ;;  %p904_p10 = scmp.lt.s32.totalorder %s3496_s2, 1  ;;  %s4478_s19 = sld [smem:[#allocation33_spill]] }
  0xaa   : > { %s4479_s10 = sld [smem:[#allocation34_spill]]  ;;  %s4481_s28 = sld [smem:[#allocation36_spill]] }
  0xab   : > { %s3935_s26 = scalar_select %p904_p10, %s3496_s2, 1 }
  0xac   : > { %s4482_s24 = sld [smem:[#allocation37_spill]]  ;;  %s4483_s22 = sld [smem:[#allocation38_spill]] }
  0xad   : > { %s2875_s16 = sshll.u32 %s3935_s26, 4  ;;  %s2880_s6 = sshll.u32 %s3935_s26, 6 }
  0xae   : > { %s4489_s21 = sld [smem:[#allocation45_spill]]  ;;  %s4490_s0 = sld [smem:[#allocation46_spill]] }
  0xaf   : > { %s908_s14 = scalar_lea.vmem %s4478_s19, %s2875_s16  ;;  %s4487_s19 = sld [smem:[#allocation43_spill]] }
  0xb0   : > { %s3948_s17 = scalar_lea.vmem %s4479_s10, %s2875_s16  ;;  %s3961_s7 = scalar_lea.vmem %s4481_s28, %s2875_s16 }
  0xb1   : > { %s4491_s25 = sld [smem:[#allocation47_spill]]  ;;  %s4008_s12 = scalar_lea.vmem [#allocation9], %s3911_s8 }
  0xb2   : > { %s3966_s27 = scalar_lea.vmem %s4482_s24, %s2875_s16  ;;  %s3971_s1 = scalar_lea.vmem %s4483_s22, %s2875_s16 }
  0xb3   : > { %s4488_s16 = sld [smem:[#allocation44_spill]]  ;;  %p2817_p11 = scmp.ne.s32.totalorder %s3496_s2, 0 }
  0xb4   : > { %s957_s13 = scalar_lea.vmem %s4489_s21, %s3935_s26  ;;  %s960_s18 = scalar_lea.vmem %s4490_s0, %s3935_s26  ;;  %vm970_vm0 = vcmask (!%p2817_p11), 261120  }
  0xb5   : > { %s949_s29 = scalar_lea.vmem %s4487_s19, %s3935_s26  ;;  %968 = sbr.rel (%p2817_p11) target bundleno = 188 (0xbc), region = 112 }
  0xb7   : > { %s963_s15 = scalar_lea.vmem %s4491_s25, %s3935_s26 }
  0xb9   : > { %s3993_s10 = scalar_lea.vmem %s4488_s16, %s2880_s6  ;;  %s4492_s6 = scalar_lea.vmem (!%p2817_p11), [#allocation3], %s3911_s8 }
  0xba   : > { %v969_v0 = vld [vmem:[%s4492_s6] sm:$0xff] (!%p2817_p11) }
  0xbb   : > { %971 = vst.msk [vmem:[%s4008_s12] sm:$0xff] (!%p2817_p11), %vm970_vm0, %v969_v0 }
  0xbc PF: > { %v3234_v1 = vld [vmem:[%s908_s14] sm:$0xff]   ;;  %v3519_v2 = vmov 0.0   ;;  %v3235_v3 = vld [vmem:[%s908_s14 + $0x8] sm:$0xff]   ;;  %vm3520_vm1 = vmmov 0   ;;  %vm991_vm2 = vcmask 261120   ;;  %s3521_s2 = smov 64   ;;  %v1035_v15 = vlaneseq  ;;  %s4494_s30 = scalar_lea.vmem %s4380_s4, %s3935_s26 }
  0xbd   : > { %2940 = vmatprep.subr.bf16.mxu1 %v3519_v2  ;;  %2966 = vmatprep.subr.bf16.mxu0 %v3519_v2  ;;  %s3522_s14 = smov 96   ;;  %s3523_s24 = smov 88   ;;  %vm1044_vm3 = vcmask 64512   ;;  %vm1109_vm4 = vcmask 1043456   ;;  %vm1269_vm6 = vcmask 130112   ;;  %vm1386_vm7 = vcmask 195712  }
  0xbe   : > { %2941 = vmatpush3.bf16.msra.mxu1 %v3234_v1  ;;  %2944 = vmatprep.mubr.msk.bf16.mxu1 %vm3520_vm1, %v3519_v2  ;;  %v4045_v16 = vshrl.u32 %v1035_v15, 7  ;;  %v4047_v17 = vand.u32 127, %v1035_v15  ;;  %s3524_s19 = smov 72   ;;  %s3525_s3 = smov 120   ;;  %vm1503_vm8 = vcmask 261312  }
  0xbf   : > { %2942 = vmatprep.subr.bf16.mxu1 %v3519_v2  ;;  %2968 = vmatprep.mubr.msk.bf16.mxu0 %vm3520_vm1, %v3519_v2  ;;  %s3526_s22 = smov 80   ;;  %s3527_s16 = smov 112  }
  0xc0   : > { %vm1039_vm5 = vcmp.ge.s32.totalorder %v4045_v16, %v4047_v17  ;;  %s3528_s11 = smov 104   ;;  %s3529_s9 = smov 56  }
  0xc1   : > { %s3530_s21 = smov 48   ;;  %s3531_s23 = smov 40  }
  0xc2   : > { %v4019_v4 = vld [vmem:[%s4008_s12] sm:$0xff]  ;;  %2943 = vmatpush3.bf16.msra.mxu1 %v3235_v3  ;;  %s4493_s20 = scalar_lea.vmem [#allocation6], %s3911_s8  ;;  %s3532_s0 = smov 8  }
  0xc3   : > { %v974_v5 = vpack.c.bf16 %v4019_v4, %v4019_v4  ;;  %2948 = vmatprep.subr.bf16.mxu1 %v3519_v2  ;;  %s3533_s8 = smov 16   ;;  %s4505_s28 = sld [smem:[#allocation41_spill]] }
  0xc5   : > { %2945 = vmatmul.mubr.msk.bf16.vlgmr.msra.gmra.mrb[0].mxu1 %vm991_vm2, %v974_v5 }
  0xc6   : > { %2950 = vmatprep.mubr.msk.bf16.mxu1 %vm3520_vm1, %v3519_v2 }
 0x198   : > { %v1029_v6 = vpop.f32.mrb[0].mxu1 }
 0x199   : > { %v4030_v7 = vpack.c.bf16 %v1029_v6, %v1029_v6  ;;  %v2946_v8 = vpop.f32.mrb[1].mxu1 }
 0x19a   : > { %v1032_v9 = vpop.f32.mrb[2].mxu1 }
 0x19b   : > { %1104 = vrot.lane.b32.xlu1 %v4030_v7, %s3521_s2  ;;  %1042 = vrot.lane.b32.xlu0 %v4030_v7, %s3522_s14  ;;  %v2947_v10 = vpop.f32.mrb[3].mxu1  ;;  %s4495_s2 = scalar_lea.vmem %s4381_s5, %s3935_s26 }
 0x19f   : > { %1156 = vrot.lane.b32.xlu1 %v4030_v7, %s3523_s24 }
 0x20d   : > { %v1043_v11 = vpop.permute.xlu0 %1042  ;;  %v1105_v13 = vpop.permute.xlu1 %1104 }
 0x20e   : > { %v1049_v12 = vsel %vm1044_vm3, %v1043_v11, 0  ;;  %v1111_v14 = vsel %vm1109_vm4, %v1105_v13, 0 }
 0x20f   : > { %2949 = vmatpush3.bf16.xpose.msra.mxu1 %v1049_v12 }
 0x210   : > { %2954 = vmatprep.subr.bf16.mxu1 %v3519_v2 }
 0x211   : > { %v1157_v29 = vpop.permute.xlu1 %1156 }
 0x212   : > { %v1162_v35 = vsel %vm1044_vm3, %v1157_v29, 0 }
 0x216   : > { %2951 = vmatmul.mubr.msk.bf16.vlgmr.msra.gmra.mrb[4].mxu1 %vm1044_vm3, %v4030_v7 }
 0x217   : > { %2955 = vmatpush3.bf16.msra.mxu1 %v1111_v14  ;;  %2956 = vmatprep.mubr.msk.bf16.mxu1 %vm3520_vm1, %v3519_v2 }
 0x218   : > { %2960 = vmatprep.subr.bf16.mxu1 %v3519_v2 }
 0x2e9   : > { %v1085_v18 = vpop.f32.mrb[4].mxu1 }
 0x2ea   : > { %v1091_v19 = vsel %vm1039_vm5, %v1085_v18, -1e+20  ;;  %v2952_v20 = vpop.f32.mrb[5].mxu1 }
 0x2eb   : > { %v1088_v21 = vpop.f32.mrb[6].mxu1  ;;  %v1092_v22 = vsel %vm1044_vm3, %v1091_v19, -inf }
 0x2ec   : > { %1093 = vmax.xlane.f32.xlu0 %v1092_v22  ;;  %v2953_v23 = vpop.f32.mrb[7].mxu1 }
 0x302   : > { %1390 = vrot.lane.b32.xlu0 %v4030_v7, %s3524_s19 }
 0x379   : > { %v1094_v24 = vpop.xlane.xlu0 %1093 }
 0x37a   : > { %v1095_v25 = vsub.f32 %v1091_v19, %v1094_v24 }
 0x37c   : > { %v1096_v26 = vmul.f32 1.442695, %v1095_v25 }
 0x37d   : > { %v1391_v38 = vpop.permute.xlu0 %1390 }
 0x37e   : > { %3254 = vpow2.f32 %v1096_v26  ;;  %v1396_v40 = vsel %vm1044_vm3, %v1391_v38, 0 }
 0x388   : > { %v3255_v27 = vpop.eup %3254 }
 0x389   : > { %v1098_v28 = vsel %vm1044_vm3, %v3255_v27, 0.0 }
 0x38a   : > { %1099 = vadd.xlane.f32.xlu1 %v1098_v28 }
 0x39b   : > { %1154 = vrot.lane.b32.xlu1 %v4030_v7, %s3525_s3 }
 0x39f   : > { %1273 = vrot.lane.b32.xlu1 %v4030_v7, %s3526_s22 }
 0x3a3   : > { %1271 = vrot.lane.b32.xlu1 %v4030_v7, %s3527_s16 }
 0x3a7   : > { %1388 = vrot.lane.b32.xlu1 %v4030_v7, %s3528_s11 }
 0x417   : > { %v1100_v30 = vpop.xlane.xlu1 %1099 }
 0x418   : > { %3256 = vrcp.f32 %v1100_v30 }
 0x41b   : > { %v1155_v34 = vpop.permute.xlu1 %1154 }
 0x41f   : > { %v1274_v36 = vpop.permute.xlu1 %1273 }
 0x420   : > { %v1279_v37 = vsel %vm1044_vm3, %v1274_v36, 0  ;;  %v3237_v36 = vld [vmem:[%s3961_s7 + $0x8] sm:$0xff]  }
 0x422   : > { %v3257_v31 = vpop.eup %3256 }
 0x423   : > { %v1102_v32 = vmul.f32 %v3257_v31, %v3255_v27  ;;  %v1272_v39 = vpop.permute.xlu1 %1271 }
 0x425   : > { %v1103_v33 = vpack.c.bf16 %v1102_v32, %v1102_v32 }
 0x427   : > { %2957 = vmatmul.mubr.msk.bf16.vlgmr.msra.gmra.mrb[8].mxu1 %vm1044_vm3, %v1103_v33  ;;  %v1389_v41 = vpop.permute.xlu1 %1388 }
 0x428   : > { %2961 = vmatpush3.bf16.xpose.msra.mxu1 %v1162_v35  ;;  %2962 = vmatprep.mubr.msk.bf16.mxu1 %vm3520_vm1, %v3519_v2 }
 0x429   : > { %2972 = vmatprep.subr.bf16.mxu1 %v3519_v2 }
 0x42f   : > { %2963 = vmatmul.mubr.msk.bf16.vlgmr.msra.gmra.mrb[12].mxu1 %vm1044_vm3, %v1155_v34  ;;  %v3236_v34 = vld [vmem:[%s3961_s7] sm:$0xff]   ;;  %s3534_s7 = smov 24  }
 0x430   : > { %2973 = vmatpush3.bf16.xpose.msra.mxu1 %v1279_v37  ;;  %2974 = vmatprep.mubr.msk.bf16.mxu1 %vm3520_vm1, %v3519_v2  ;;  %v973_v37 = vld [vmem:[%s4493_s20] sm:$0xff] }
 0x431   : > { %2984 = vmatprep.subr.bf16.mxu1 %v3519_v2  ;;  %v1604_v38 = vpack.c.bf16 %v973_v37, %v973_v37 }
 0x437   : > { %2975 = vmatmul.mubr.msk.bf16.vlgmr.msra.gmra.mrb[16].mxu1 %vm1044_vm3, %v1272_v39 }
 0x438   : > { %2985 = vmatpush3.bf16.xpose.msra.mxu1 %v1396_v40  ;;  %2986 = vmatprep.mubr.msk.bf16.mxu1 %vm3520_vm1, %v3519_v2 }
 0x439   : > { %2996 = vmatprep.subr.bf16.mxu1 %v3519_v2 }
 0x43f   : > { %2987 = vmatmul.mubr.msk.bf16.vlgmr.msra.gmra.mrb[20].mxu1 %vm1044_vm3, %v1389_v41 }
 0x440   : > { %3000 = vmatprep.mubr.msk.bf16.mxu1 %vm3520_vm1, %v3519_v2 }
 0x4fa   : > { %v1147_v42 = vpop.f32.mrb[8].mxu1 }
 0x4fb   : > { %1153 = vst.msk [vmem:[#allocation2] sm:$0xff] %vm1044_vm3, %v1147_v42  ;;  %v2958_v43 = vpop.f32.mrb[9].mxu1 }
 0x4fc   : > { %v1150_v44 = vpop.f32.mrb[10].mxu1  ;;  %v3238_v43 = vld [vmem:[%s3948_s17] sm:$0xff]  }
 0x4fd   : > { %v2959_v45 = vpop.f32.mrb[11].mxu1  ;;  %2997 = vmatpush3.bf16.msra.mxu1 %v3238_v43  ;;  %v3239_v44 = vld [vmem:[%s3948_s17 + $0x8] sm:$0xff]  }
 0x4fe   : > { %2998 = vmatprep.subr.bf16.mxu1 %v3519_v2 }
 0x501   : > { %2999 = vmatpush3.bf16.msra.mxu1 %v3239_v44 }
 0x502   : > { %v1198_v46 = vpop.f32.mrb[12].mxu1  ;;  %3012 = vmatprep.subr.bf16.mxu1 %v3519_v2 }
 0x503   : > { %v1204_v47 = vsel %vm1039_vm5, %v1198_v46, -1e+20  ;;  %v2964_v48 = vpop.f32.mrb[13].mxu1 }
 0x504   : > { %v1201_v49 = vpop.f32.mrb[14].mxu1  ;;  %v1205_v50 = vsel %vm1044_vm3, %v1204_v47, -inf }
 0x505   : > { %1206 = vmax.xlane.f32.xlu1 %v1205_v50  ;;  %v2965_v51 = vpop.f32.mrb[15].mxu1 }
 0x50a   : > { %v1315_v52 = vpop.f32.mrb[16].mxu1 }
 0x50b   : > { %v1321_v53 = vsel %vm1039_vm5, %v1315_v52, -1e+20  ;;  %v2976_v54 = vpop.f32.mrb[17].mxu1 }
 0x50c   : > { %v1318_v55 = vpop.f32.mrb[18].mxu1  ;;  %v1322_v56 = vsel %vm1044_vm3, %v1321_v53, -inf }
 0x50d   : > { %1323 = vmax.xlane.f32.xlu0 %v1322_v56  ;;  %v2977_v57 = vpop.f32.mrb[19].mxu1 }
 0x512   : > { %v1432_v58 = vpop.f32.mrb[20].mxu1 }
 0x513   : > { %v1438_v59 = vsel %vm1039_vm5, %v1432_v58, -1e+20  ;;  %v2988_v60 = vpop.f32.mrb[21].mxu1 }
 0x514   : > { %v1435_v61 = vpop.f32.mrb[22].mxu1  ;;  %v1439_v62 = vsel %vm1044_vm3, %v1438_v59, -inf }
 0x515   : > { %1440 = vmax.xlane.f32.xlu1 %v1439_v62  ;;  %v2989_v63 = vpop.f32.mrb[23].mxu1 }
 0x592   : > { %v1207_v0 = vpop.xlane.xlu1 %1206 }
 0x593   : > { %v1208_v1 = vsub.f32 %v1204_v47, %v1207_v0 }
 0x595   : > { %v1209_v3 = vmul.f32 1.442695, %v1208_v1 }
 0x597   : > { %3258 = vpow2.f32 %v1209_v3 }
 0x59a   : > { %v1324_v13 = vpop.xlane.xlu0 %1323 }
 0x59b   : > { %v1325_v14 = vsub.f32 %v1321_v53, %v1324_v13  ;;  %v2829_v13 = vld [vmem:[%s4494_s30] ss:$0 sm:$0xff]  ;;  %s4506_s30 = scalar_lea.vmem %s4505_s28, %s3935_s26 }
 0x59d   : > { %v1326_v15 = vmul.f32 1.442695, %v1325_v14 }
 0x5a1   : > { %v3259_v5 = vpop.eup %3258 }
 0x5a2   : > { %v1441_v6 = vpop.xlane.xlu1 %1440  ;;  %v1211_v8 = vsel %vm1044_vm3, %v3259_v5, 0.0 }
 0x5a3   : > { %v1442_v9 = vsub.f32 %v1438_v59, %v1441_v6  ;;  %1212 = vadd.xlane.f32.xlu1 %v1211_v8 }
 0x5a5   : > { %v1443_v10 = vmul.f32 1.442695, %v1442_v9 }
 0x5a7   : > { %3260 = vpow2.f32 %v1443_v10 }
 0x5a8   : > { %3262 = vpow2.f32 %v1326_v15 }
 0x5b1   : > { %v3261_v11 = vpop.eup %3260 }
 0x5b2   : > { %v1445_v12 = vsel %vm1044_vm3, %v3261_v11, 0.0  ;;  %v3263_v16 = vpop.eup %3262 }
 0x5b3   : > { %1446 = vadd.xlane.f32.xlu0 %v1445_v12  ;;  %v1328_v17 = vsel %vm1044_vm3, %v3263_v16, 0.0 }
 0x5b4   : > { %1217 = vrot.lane.b32.xlu1 %v4030_v7, %s3529_s9 }
 0x5c9   : > { %1334 = vrot.lane.b32.xlu0 %v4030_v7, %s3530_s21 }
 0x5d8   : > { %1329 = vadd.xlane.f32.xlu1 %v1328_v17 }
 0x5e9   : > { %1451 = vrot.lane.b32.xlu1 %v4030_v7, %s3531_s23 }
 0x630   : > { %v1213_v18 = vpop.xlane.xlu1 %1212 }
 0x631   : > { %3264 = vrcp.f32 %v1213_v18 }
 0x634   : > { %v1218_v19 = vpop.permute.xlu1 %1217 }
 0x635   : > { %v1223_v20 = vsel %vm1109_vm4, %v1218_v19, 0 }
 0x636   : > { %2967 = vmatpush3.bf16.msra.mxu0 %v1223_v20 }
 0x637   : > { %2978 = vmatprep.subr.bf16.mxu0 %v3519_v2 }
 0x63b   : > { %v3265_v21 = vpop.eup %3264 }
 0x63c   : > { %v1215_v22 = vmul.f32 %v3265_v21, %v3259_v5 }
 0x63e   : > { %v1216_v23 = vpack.c.bf16 %v1215_v22, %v1215_v22 }
 0x640   : > { %v1447_v24 = vpop.xlane.xlu0 %1446  ;;  %2969 = vmatmul.mubr.msk.bf16.vlgmr.msra.gmra.mrb[0].mxu0 %vm1044_vm3, %v1216_v23 }
 0x641   : > { %2980 = vmatprep.mubr.msk.bf16.mxu0 %vm3520_vm1, %v3519_v2 }
 0x644   : > { %v1335_v25 = vpop.permute.xlu0 %1334 }
 0x645   : > { %v1340_v7 = vsel %vm1109_vm4, %v1335_v25, 0 }
 0x646   : > { %2979 = vmatpush3.bf16.msra.mxu0 %v1340_v7 }
 0x647   : > { %2990 = vmatprep.subr.bf16.mxu0 %v3519_v2 }
 0x665   : > { %v1330_v26 = vpop.xlane.xlu1 %1329 }
 0x666   : > { %3266 = vrcp.f32 %v1330_v26 }
 0x667   : > { %3268 = vrcp.f32 %v1447_v24 }
 0x669   : > { %v1452_v29 = vpop.permute.xlu1 %1451 }
 0x66a   : > { %v1457_v32 = vsel %vm1109_vm4, %v1452_v29, 0 }
 0x670   : > { %v3267_v27 = vpop.eup %3266 }
 0x671   : > { %v1332_v28 = vmul.f32 %v3267_v27, %v3263_v16  ;;  %v3269_v31 = vpop.eup %3268 }
 0x672   : > { %v1449_v33 = vmul.f32 %v3269_v31, %v3261_v11 }
 0x673   : > { %v1333_v30 = vpack.c.bf16 %v1332_v28, %v1332_v28 }
 0x674   : > { %v1450_v35 = vpack.c.bf16 %v1449_v33, %v1449_v33 }
 0x675   : > { %2981 = vmatmul.mubr.msk.bf16.vlgmr.msra.gmra.mrb[4].mxu0 %vm1044_vm3, %v1333_v30 }
 0x676   : > { %2991 = vmatpush3.bf16.msra.mxu0 %v1457_v32  ;;  %2992 = vmatprep.mubr.msk.bf16.mxu0 %vm3520_vm1, %v3519_v2 }
 0x677   : > { %3004 = vmatprep.subr.bf16.mxu0 %v3519_v2 }
 0x67d   : > { %2993 = vmatmul.mubr.msk.bf16.vlgmr.msra.gmra.mrb[8].mxu0 %vm1044_vm3, %v1450_v35 }
 0x67e   : > { %3005 = vmatpush3.bf16.msra.mxu0 %v3236_v34  ;;  %3008 = vmatprep.mubr.msk.bf16.mxu0 %vm3520_vm1, %v3519_v2 }
 0x67f   : > { %3006 = vmatprep.subr.bf16.mxu0 %v3519_v2 }
 0x682   : > { %3007 = vmatpush3.bf16.msra.mxu0 %v3237_v36 }
 0x683   : > { %3020 = vmatprep.subr.bf16.mxu0 %v3519_v2 }
 0x685   : > { %3009 = vmatmul.mubr.msk.bf16.vlgmr.msra.gmra.mrb[12].mxu0 %vm991_vm2, %v1604_v38 }
 0x686   : > { %3022 = vmatprep.mubr.msk.bf16.mxu0 %vm3520_vm1, %v3519_v2 }
 0x713   : > { %v1259_v39 = vpop.f32.mrb[0].mxu0 }
 0x714   : > { %1266 = vrot.lane.b32.xlu1 %v1259_v39, %s3532_s0  ;;  %v2970_v40 = vpop.f32.mrb[1].mxu0 }
 0x715   : > { %v1262_v41 = vpop.f32.mrb[2].mxu0 }
 0x716   : > { %v2971_v42 = vpop.f32.mrb[3].mxu0 }
 0x748   : > { %v1376_v45 = vpop.f32.mrb[4].mxu0 }
 0x749   : > { %1383 = vrot.lane.b32.xlu0 %v1376_v45, %s3533_s8  ;;  %v2982_v46 = vpop.f32.mrb[5].mxu0 }
 0x74a   : > { %v1379_v47 = vpop.f32.mrb[6].mxu0 }
 0x74b   : > { %v2983_v48 = vpop.f32.mrb[7].mxu0 }
 0x750   : > { %v1493_v49 = vpop.f32.mrb[8].mxu0 }
 0x751   : > { %1500 = vrot.lane.b32.xlu1 %v1493_v49, %s3534_s7  ;;  %v2994_v50 = vpop.f32.mrb[9].mxu0 }
 0x752   : > { %v1496_v51 = vpop.f32.mrb[10].mxu0 }
 0x753   : > { %v2995_v52 = vpop.f32.mrb[11].mxu0 }
 0x758   : > { %v1658_v53 = vpop.f32.mrb[12].mxu0 }
 0x759   : > { %v1724_v54 = vpack.c.bf16 %v1658_v53, %v1658_v53  ;;  %v3010_v55 = vpop.f32.mrb[13].mxu0 }
 0x75a   : > { %v1661_v56 = vpop.f32.mrb[14].mxu0 }
 0x75b   : > { %1727 = vrot.lane.b32.xlu0 %v1724_v54, %s3522_s14  ;;  %1836 = vrot.lane.b32.xlu1 %v1724_v54, %s3523_s24  ;;  %v3011_v57 = vpop.f32.mrb[15].mxu0  ;;  %s4496_s24 = sld [smem:[#allocation35_spill]] }
 0x75f   : > { %1834 = vrot.lane.b32.xlu1 %v1724_v54, %s3525_s3 }
 0x763   : > { %1952 = vrot.lane.b32.xlu1 %v1724_v54, %s3526_s22  ;;  %s4498_s22 = sld [smem:[#allocation39_spill]] }
 0x767   : > { %1950 = vrot.lane.b32.xlu1 %v1724_v54, %s3527_s16 }
 0x76b   : > { %2067 = vrot.lane.b32.xlu1 %v1724_v54, %s3524_s19  ;;  %s4497_s19 = scalar_lea.vmem %s4496_s24, %s3935_s26 }
 0x76f   : > { %2065 = vrot.lane.b32.xlu1 %v1724_v54, %s3528_s11 }
 0x786   : > { %v1267_v58 = vpop.permute.xlu1 %1266 }
 0x787   : > { %1270 = vst.msk [vmem:[#allocation2] sm:$0xff] %vm1269_vm6, %v1267_v58 }
 0x7bb   : > { %v1384_v59 = vpop.permute.xlu0 %1383 }
 0x7bc   : > { %1387 = vst.msk [vmem:[#allocation2] sm:$0xff] %vm1386_vm7, %v1384_v59 }
 0x7c3   : > { %v1501_v60 = vpop.permute.xlu1 %1500 }
 0x7c4   : > { %1504 = vst.msk [vmem:[#allocation2] sm:$0xff] %vm1503_vm8, %v1501_v60 }
 0x7cb   : > { %v1505_v61 = vld [vmem:[#allocation2] sm:$0xff] }
 0x7cc   : > { %v1506_v62 = vpack.c.bf16 %v1505_v61, %v1505_v61 }
 0x7cd   : > { %v1728_v63 = vpop.permute.xlu0 %1727  ;;  %v1837_v0 = vpop.permute.xlu1 %1836 }
 0x7ce   : > { %v1733_v1 = vsel %vm1044_vm3, %v1728_v63, 0  ;;  %3001 = vmatmul.mubr.msk.bf16.vlgmr.msra.gmra.mrb[24].mxu1 %vm991_vm2, %v1506_v62  ;;  %v1842_v5 = vsel %vm1044_vm3, %v1837_v0, 0  ;;  %v3240_v62 = vld [vmem:[%s3966_s27] sm:$0xff]   ;;  %v3241_v63 = vld [vmem:[%s3966_s27 + $0x8] sm:$0xff]  }
 0x7cf   : > { %3021 = vmatpush3.bf16.xpose.msra.mxu0 %v1733_v1  ;;  %3016 = vmatprep.mubr.msk.bf16.mxu1 %vm3520_vm1, %v3519_v2 }
 0x7d0   : > { %3032 = vmatprep.subr.bf16.mxu0 %v3519_v2  ;;  %3013 = vmatpush3.bf16.msra.mxu1 %v3240_v62 }
 0x7d1   : > { %v1835_v3 = vpop.permute.xlu1 %1834  ;;  %3014 = vmatprep.subr.bf16.mxu1 %v3519_v2 }
 0x7d4   : > { %3015 = vmatpush3.bf16.msra.mxu1 %v3241_v63 }
 0x7d5   : > { %v1953_v6 = vpop.permute.xlu1 %1952  ;;  %3026 = vmatprep.subr.bf16.mxu1 %v3519_v2 }
 0x7d6   : > { %3023 = vmatmul.mubr.msk.bf16.vlgmr.msra.gmra.mrb[16].mxu0 %vm1044_vm3, %v1724_v54  ;;  %v1958_v9 = vsel %vm1044_vm3, %v1953_v6, 0 }
 0x7d7   : > { %3033 = vmatpush3.bf16.xpose.msra.mxu0 %v1842_v5  ;;  %3034 = vmatprep.mubr.msk.bf16.mxu0 %vm3520_vm1, %v3519_v2 }
 0x7d8   : > { %3044 = vmatprep.subr.bf16.mxu0 %v3519_v2 }
 0x7d9   : > { %v1951_v8 = vpop.permute.xlu1 %1950 }
 0x7dd   : > { %v2068_v10 = vpop.permute.xlu1 %2067 }
 0x7de   : > { %3035 = vmatmul.mubr.msk.bf16.vlgmr.msra.gmra.mrb[20].mxu0 %vm1044_vm3, %v1835_v3  ;;  %v2073_v11 = vsel %vm1044_vm3, %v2068_v10, 0 }
 0x7df   : > { %3045 = vmatpush3.bf16.xpose.msra.mxu0 %v1958_v9  ;;  %3046 = vmatprep.mubr.msk.bf16.mxu0 %vm3520_vm1, %v3519_v2  ;;  %v2833_v9 = vld [vmem:[%s4495_s2] ss:$0 sm:$0xff] }
 0x7e0   : > { %3056 = vmatprep.subr.bf16.mxu0 %v3519_v2 }
 0x7e1   : > { %v2066_v12 = vpop.permute.xlu1 %2065 }
 0x7e6   : > { %3047 = vmatmul.mubr.msk.bf16.vlgmr.msra.gmra.mrb[24].mxu0 %vm1044_vm3, %v1951_v8 }
 0x7e7   : > { %3057 = vmatpush3.bf16.xpose.msra.mxu0 %v2073_v11  ;;  %3058 = vmatprep.mubr.msk.bf16.mxu0 %vm3520_vm1, %v3519_v2  ;;  %v2834_v11 = vld [vmem:[%s4497_s19] ss:$0 sm:$0xff] }
 0x7e8   : > { %3068 = vmatprep.subr.bf16.mxu0 %v3519_v2 }
 0x7ee   : > { %3059 = vmatmul.mubr.msk.bf16.vlgmr.msra.gmra.mrb[28].mxu0 %vm1044_vm3, %v2066_v12 }
 0x7ef   : > { %3072 = vmatprep.mubr.msk.bf16.mxu0 %vm3520_vm1, %v3519_v2 }
 0x8a1   : > { %v1567_v14 = vpop.f32.mrb[24].mxu1 }
 0x8a2   : > { %v1568_v15 = vadd.f32 %v2829_v13, %v1567_v14  ;;  %v3002_v16 = vpop.f32.mrb[25].mxu1 }
 0x8a3   : > { %v1570_v17 = vpop.f32.mrb[26].mxu1 }
 0x8a4   : > { %v3003_v18 = vpop.f32.mrb[27].mxu1  ;;  %v1573_v19 = vadd.f32 %v1568_v15, %v4019_v4 }
 0x8a6   : > { %v1576_v20 = vsel %vm991_vm2, %v1573_v19, 0.0 }
 0x8a7   : > { %1577 = vadd.xlane.f32.xlu0 %v1576_v20 }
 0x8a9   : > { %v1769_v21 = vpop.f32.mrb[16].mxu0 }
 0x8aa   : > { %v1775_v22 = vsel %vm1044_vm3, %v1769_v21, -inf  ;;  %v3024_v23 = vpop.f32.mrb[17].mxu0 }
 0x8ab   : > { %1776 = vmax.xlane.f32.xlu0 %v1775_v22  ;;  %v1772_v24 = vpop.f32.mrb[18].mxu0 }
 0x8ac   : > { %v3025_v25 = vpop.f32.mrb[19].mxu0 }
 0x8b1   : > { %v1878_v7 = vpop.f32.mrb[20].mxu0 }
 0x8b2   : > { %v1884_v26 = vsel %vm1044_vm3, %v1878_v7, -inf  ;;  %v3036_v27 = vpop.f32.mrb[21].mxu0 }
 0x8b3   : > { %1885 = vmax.xlane.f32.xlu0 %v1884_v26  ;;  %v1881_v28 = vpop.f32.mrb[22].mxu0 }
 0x8b4   : > { %v3037_v29 = vpop.f32.mrb[23].mxu0 }
 0x8b9   : > { %v1994_v30 = vpop.f32.mrb[24].mxu0 }
 0x8ba   : > { %v2000_v4 = vsel %vm1044_vm3, %v1994_v30, -inf  ;;  %v3048_v31 = vpop.f32.mrb[25].mxu0 }
 0x8bb   : > { %2001 = vmax.xlane.f32.xlu0 %v2000_v4  ;;  %v1997_v32 = vpop.f32.mrb[26].mxu0 }
 0x8bc   : > { %v3049_v33 = vpop.f32.mrb[27].mxu0 }
 0x8c1   : > { %v2109_v34 = vpop.f32.mrb[28].mxu0 }
 0x8c2   : > { %v2115_v35 = vsel %vm1044_vm3, %v2109_v34, -inf  ;;  %v3060_v36 = vpop.f32.mrb[29].mxu0 }
 0x8c3   : > { %2116 = vmax.xlane.f32.xlu0 %v2115_v35  ;;  %v2112_v37 = vpop.f32.mrb[30].mxu0 }
 0x8c4   : > { %v3061_v38 = vpop.f32.mrb[31].mxu0 }
 0x934   : > { %v1578_v39 = vpop.xlane.xlu0 %1577 }
 0x935   : > { %v1580_v40 = vmul.f32 0.03125, %v1578_v39 }
 0x937   : > { %v1581_v41 = vsub.f32 %v1573_v19, %v1580_v40 }
 0x938   : > { %v1777_v42 = vpop.xlane.xlu0 %1776 }
 0x939   : > { %v1778_v43 = vsub.f32 %v1769_v21, %v1777_v42  ;;  %v1582_v44 = vmul.f32 %v1581_v41, %v1581_v41 }
 0x93b   : > { %v1779_v45 = vmul.f32 1.442695, %v1778_v43  ;;  %v1583_v46 = vsel %vm991_vm2, %v1582_v44, 0.0 }
 0x93c   : > { %1584 = vadd.xlane.f32.xlu1 %v1583_v46 }
 0x93d   : > { %3270 = vpow2.f32 %v1779_v45 }
 0x940   : > { %v1886_v47 = vpop.xlane.xlu0 %1885 }
 0x941   : > { %v1887_v48 = vsub.f32 %v1878_v7, %v1886_v47 }
 0x943   : > { %v1888_v49 = vmul.f32 1.442695, %v1887_v48 }
 0x945   : > { %3272 = vpow2.f32 %v1888_v49  ;;  %v3242_v49 = vld [vmem:[%s3971_s1] sm:$0xff]  }
 0x946   : > { %3069 = vmatpush3.bf16.msra.mxu0 %v3242_v49 }
 0x947   : > { %v3271_v50 = vpop.eup %3270  ;;  %3070 = vmatprep.subr.bf16.mxu0 %v3519_v2 }
 0x948   : > { %v2002_v51 = vpop.xlane.xlu0 %2001  ;;  %v1781_v52 = vsel %vm1044_vm3, %v3271_v50, 0.0 }
 0x949   : > { %v2003_v53 = vsub.f32 %v1994_v30, %v2002_v51  ;;  %1782 = vadd.xlane.f32.xlu0 %v1781_v52 }
 0x94b   : > { %v2004_v54 = vmul.f32 1.442695, %v2003_v53 }
 0x94d   : > { %3274 = vpow2.f32 %v2004_v54 }
 0x94f   : > { %v3273_v55 = vpop.eup %3272 }
 0x950   : > { %v2117_v56 = vpop.xlane.xlu0 %2116  ;;  %v1890_v57 = vsel %vm1044_vm3, %v3273_v55, 0.0 }
 0x951   : > { %v2118_v58 = vsub.f32 %v2109_v34, %v2117_v56  ;;  %1891 = vadd.xlane.f32.xlu0 %v1890_v57 }
 0x953   : > { %v2119_v59 = vmul.f32 1.442695, %v2118_v58 }
 0x955   : > { %3276 = vpow2.f32 %v2119_v59 }
 0x957   : > { %v3275_v60 = vpop.eup %3274 }
 0x958   : > { %v2006_v61 = vsel %vm1044_vm3, %v3275_v60, 0.0 }
 0x959   : > { %2007 = vadd.xlane.f32.xlu0 %v2006_v61 }
 0x95f   : > { %v4185_v0 = vpop.eup %3276 }
 0x960   : > { %v2121_v1 = vsel %vm1044_vm3, %v4185_v0, 0.0 }
 0x961   : > { %2122 = vadd.xlane.f32.xlu1 %v2121_v1 }
 0x9c9   : > { %v1585_v3 = vpop.xlane.xlu1 %1584 }
 0x9ca   : > { %v1586_v5 = vmul.f32 0.03125, %v1585_v3 }
 0x9cc   : > { %v1587_v6 = vadd.f32 1e-05, %v1586_v5 }
 0x9ce   : > { %3278 = vrsqrt.f32 %v1587_v6 }
 0x9d6   : > { %v1783_v15 = vpop.xlane.xlu0 %1782 }
 0x9d7   : > { %3280 = vrcp.f32 %v1783_v15 }
 0x9d8   : > { %v3279_v8 = vpop.eup %3278 }
 0x9d9   : > { %v1589_v10 = vmul.f32 %v3279_v8, %v1581_v41 }
 0x9db   : > { %v1596_v12 = vmul.f32 %v2833_v9, %v1589_v10 }
 0x9dd   : > { %v4200_v13 = vadd.f32 %v2834_v11, %v1596_v12 }
 0x9de   : > { %v1892_v25 = vpop.xlane.xlu0 %1891 }
 0x9df   : > { %v1664_v14 = vpack.c.bf16 %v4200_v13, %v4200_v13  ;;  %3282 = vrcp.f32 %v1892_v25 }
 0x9e1   : > { %3017 = vmatmul.mubr.msk.bf16.vlgmr.msra.gmra.mrb[28].mxu1 %vm991_vm2, %v1664_v14  ;;  %v3281_v16 = vpop.eup %3280 }
 0x9e2   : > { %3028 = vmatprep.mubr.msk.bf16.mxu1 %vm3520_vm1, %v3519_v2  ;;  %v1785_v18 = vmul.f32 %v3281_v16, %v3271_v50  ;;  %v3243_v50 = vld [vmem:[%s3971_s1 + $0x8] sm:$0xff]  }
 0x9e3   : > { %3071 = vmatpush3.bf16.msra.mxu0 %v3243_v50 }
 0x9e4   : > { %v1786_v24 = vpack.c.bf16 %v1785_v18, %v1785_v18  ;;  %3084 = vmatprep.subr.bf16.mxu0 %v3519_v2 }
 0x9e6   : > { %v2008_v7 = vpop.xlane.xlu0 %2007 }
 0x9e7   : > { %3284 = vrcp.f32 %v2008_v7 }
 0x9e9   : > { %v3283_v26 = vpop.eup %3282 }
 0x9ea   : > { %v1894_v28 = vmul.f32 %v3283_v26, %v3273_v55 }
 0x9ec   : > { %v1895_v31 = vpack.c.bf16 %v1894_v28, %v1894_v28 }
 0x9ee   : > { %v2123_v27 = vpop.xlane.xlu1 %2122 }
 0x9ef   : > { %3286 = vrcp.f32 %v2123_v27 }
 0x9f1   : > { %v3285_v32 = vpop.eup %3284 }
 0x9f2   : > { %v2010_v34 = vmul.f32 %v3285_v32, %v3275_v60  ;;  %v3252_v32 = vld [vmem:[%s3993_s10 + $0x30] sm:$0xff]  }
 0x9f4   : > { %v2011_v36 = vpack.c.bf16 %v2010_v34, %v2010_v34  ;;  %v2855_v34 = vld [vmem:[%s949_s29] ss:$0 sm:$0xff]  ;;  %s4509_s29 = sld [smem:[#allocation19_spill]] }
 0x9f9   : > { %v3287_v37 = vpop.eup %3286 }
 0x9fa   : > { %v2125_v39 = vmul.f32 %v3287_v37, %v4185_v0 }
 0x9fc   : > { %v2126_v40 = vpack.c.bf16 %v2125_v39, %v2125_v39 }
 0xab4   : > { %v1718_v17 = vpop.f32.mrb[28].mxu1 }
 0xab5   : > { %v1725_v19 = vpack.c.bf16 %v1718_v17, %v1718_v17  ;;  %v3018_v20 = vpop.f32.mrb[29].mxu1 }
 0xab6   : > { %v1721_v21 = vpop.f32.mrb[30].mxu1  ;;  %v3248_v20 = vld [vmem:[%s3993_s10 + $0x10] sm:$0xff]  }
 0xab7   : > { %2012 = vrot.lane.b32.xlu1 %v1725_v19, %s3527_s16  ;;  %1897 = vrot.lane.b32.xlu0 %v1725_v19, %s3525_s3  ;;  %v3019_v22 = vpop.f32.mrb[31].mxu1  ;;  %v1791_v23 = vsel %vm1109_vm4, %v1725_v19, 0  ;;  %s4499_s16 = scalar_lea.vmem %s4498_s22, %s3935_s26  ;;  %v3249_v21 = vld [vmem:[%s3993_s10 + $0x18] sm:$0xff]  }
 0xab8   : > { %3027 = vmatpush3.bf16.msra.mxu1 %v1791_v23  ;;  %v2849_v0 = vld [vmem:[%s4499_s16] ss:$0 sm:$0xff]  ;;  %v3251_v23 = vld [vmem:[%s3993_s10 + $0x28] sm:$0xff]  }
 0xab9   : > { %3038 = vmatprep.subr.bf16.mxu1 %v3519_v2  ;;  %v3250_v22 = vld [vmem:[%s3993_s10 + $0x20] sm:$0xff]  }
 0xabb   : > { %2127 = vrot.lane.b32.xlu1 %v1725_v19, %s3528_s11  ;;  %3029 = vmatmul.mubr.msk.bf16.vlgmr.msra.gmra.mrb[32].mxu1 %vm1044_vm3, %v1786_v24  ;;  %s4500_s11 = sld [smem:[#allocation30_spill]]  ;;  %v3247_v19 = vld [vmem:[%s3993_s10 + $0x8] sm:$0xff]  }
 0xabc   : > { %3040 = vmatprep.mubr.msk.bf16.mxu1 %vm3520_vm1, %v3519_v2 }
 0xac1   : > { %s4501_s9 = scalar_lea.vmem [#allocation8], %s4500_s11 }
 0xac2   : > { %v3244_v17 = vld [vmem:[%s4501_s9] sm:$0xff]   ;;  %s4502_s21 = smov %s4501_s9  ;;  %s2871_s9 = sshll.u32 %s4509_s29, 7 }
 0xac3   : > { %v3245_v18 = vld [vmem:[%s4502_s21 + $0x8] sm:$0xff]   ;;  %s2503_s21 = sshll.u32 %s4008_s12, 4  ;;  %s4313_s21 = int_to_ptr.vmem [resolvable:$true] %s2503_s21 }
 0xac4   : > { %s3382_s17 = scalar_lea.vmem %s4313_s21, 128 }
 0xac5   : > { %p3383_p7 = scmp.ne.s32.totalorder %s4313_s21, %s3382_s17 }
 0xb29   : > { %v1898_v29 = vpop.permute.xlu0 %1897  ;;  %v2013_v4 = vpop.permute.xlu1 %2012 }
 0xb2a   : > { %v1903_v30 = vsel %vm1109_vm4, %v1898_v29, 0  ;;  %v2018_v33 = vsel %vm1109_vm4, %v2013_v4, 0  ;;  %v2854_v29 = vld [vmem:[%s4506_s30] ss:$0 sm:$0xff] }
 0xb2b   : > { %3039 = vmatpush3.bf16.msra.mxu1 %v1903_v30 }
 0xb2c   : > { %3050 = vmatprep.subr.bf16.mxu1 %v3519_v2 }
 0xb2d   : > { %v2128_v35 = vpop.permute.xlu1 %2127 }
 0xb2e   : > { %3041 = vmatmul.mubr.msk.bf16.vlgmr.msra.gmra.mrb[36].mxu1 %vm1044_vm3, %v1895_v31  ;;  %v2133_v38 = vsel %vm1109_vm4, %v2128_v35, 0 }
 0xb2f   : > { %3051 = vmatpush3.bf16.msra.mxu1 %v2018_v33  ;;  %3052 = vmatprep.mubr.msk.bf16.mxu1 %vm3520_vm1, %v3519_v2  ;;  %v3253_v33 = vld [vmem:[%s3993_s10 + $0x38] sm:$0xff]  }
 0xb30   : > { %3062 = vmatprep.subr.bf16.mxu1 %v3519_v2 }
 0xb36   : > { %3053 = vmatmul.mubr.msk.bf16.vlgmr.msra.gmra.mrb[40].mxu1 %vm1044_vm3, %v2011_v36 }
 0xb37   : > { %3063 = vmatpush3.bf16.msra.mxu1 %v2133_v38  ;;  %3064 = vmatprep.mubr.msk.bf16.mxu1 %vm3520_vm1, %v3519_v2 }
 0xb38   : > { %3076 = vmatprep.subr.bf16.mxu1 %v3519_v2 }
 0xb3e   : > { %3065 = vmatmul.mubr.msk.bf16.vlgmr.msra.gmra.mrb[44].mxu1 %vm1044_vm3, %v2126_v40 }
 0xb3f   : > { %3080 = vmatprep.mubr.msk.bf16.mxu1 %vm3520_vm1, %v3519_v2  ;;  %3077 = vmatpush3.bf16.msra.mxu1 %v3244_v17 }
 0xb40   : > { %3078 = vmatprep.subr.bf16.mxu1 %v3519_v2 }
 0xb43   : > { %3079 = vmatpush3.bf16.msra.mxu1 %v3245_v18 }
 0xb8e   : > { %v1827_v41 = vpop.f32.mrb[32].mxu1 }
 0xb8f   : > { %1833 = vst.msk [vmem:[#allocation2] sm:$0xff] %vm1044_vm3, %v1827_v41  ;;  %v3030_v42 = vpop.f32.mrb[33].mxu1 }
 0xb90   : > { %v1830_v43 = vpop.f32.mrb[34].mxu1 }
 0xb91   : > { %v3031_v44 = vpop.f32.mrb[35].mxu1 }
 0xc01   : > { %v1939_v45 = vpop.f32.mrb[36].mxu1 }
 0xc02   : > { %1946 = vrot.lane.b32.xlu0 %v1939_v45, %s3532_s0  ;;  %v3042_v46 = vpop.f32.mrb[37].mxu1  ;;  %s4503_s0 = sld [smem:[#allocation40_spill]] }
 0xc03   : > { %v1942_v47 = vpop.f32.mrb[38].mxu1 }
 0xc04   : > { %v3043_v48 = vpop.f32.mrb[39].mxu1 }
 0xc09   : > { %v2054_v51 = vpop.f32.mrb[40].mxu1 }
 0xc0a   : > { %2061 = vrot.lane.b32.xlu1 %v2054_v51, %s3533_s8  ;;  %v3054_v52 = vpop.f32.mrb[41].mxu1  ;;  %s4504_s8 = scalar_lea.vmem %s4503_s0, %s3935_s26  ;;  %s4514_s0 = sld [smem:[#allocation48_spill]] }
 0xc0b   : > { %v2057_v53 = vpop.f32.mrb[42].mxu1  ;;  %v2853_v27 = vld [vmem:[%s4504_s8] ss:$0 sm:$0xff] }
 0xc0c   : > { %v3055_v54 = vpop.f32.mrb[43].mxu1 }
 0xc10   : > { %s4515_s8 = smov %s4514_s0 }
 0xc11   : > { %v2169_v55 = vpop.f32.mrb[44].mxu1 }
 0xc12   : > { %2176 = vrot.lane.b32.xlu0 %v2169_v55, %s3534_s7  ;;  %v3066_v56 = vpop.f32.mrb[45].mxu1  ;;  %s4311_s7 = scalar_lea.hbm %s4514_s0, %s2871_s9 }
 0xc13   : > { %v2172_v57 = vpop.f32.mrb[46].mxu1 }
 0xc14   : > { %v3067_v58 = vpop.f32.mrb[47].mxu1 }
 0xc15   : > { %v2868_v58 = vld [vmem:[%s960_s18] ss:$0 sm:$0xff] }
 0xc74   : > { %v1947_v59 = vpop.permute.xlu0 %1946 }
 0xc75   : > { %1949 = vst.msk [vmem:[#allocation2] sm:$0xff] %vm1269_vm6, %v1947_v59 }
 0xc7c   : > { %v2062_v60 = vpop.permute.xlu1 %2061 }
 0xc7d   : > { %2064 = vst.msk [vmem:[#allocation2] sm:$0xff] %vm1386_vm7, %v2062_v60  ;;  %v2869_v60 = vld [vmem:[%s963_s15] ss:$0 sm:$0xff]  ;;  %s3535_s15 = smov [#allocation9]  }
 0xc7e   : > { %s3386_s26 = sshll.u32 %s3535_s15, 4  ;;  %s3387_s26 = int_to_ptr.vmem [resolvable:$false] %s3386_s26 }
 0xc7f   : > { %s3388_s28 = scalar_lea.vmem %s3387_s26, 256  ;;  %p3389_p4 = scmp.lt.s32.totalorder %s4313_s21, %s3387_s26 }
 0xc80   : > { %p3390_p6 = scmp.lt.s32.totalorder %s3388_s28, %s3382_s17 }
 0xc82   : > { %p3391_p5 = por %p3390_p6, %p3389_p4 }
 0xc84   : > { %v2177_v61 = vpop.permute.xlu0 %2176 }
 0xc85   : > { %2179 = vst.msk [vmem:[#allocation2] sm:$0xff] %vm1503_vm8, %v2177_v61 }
 0xc8c   : > { %v2180_v62 = vld [vmem:[#allocation2] sm:$0xff] }
 0xc8d   : > { %v2181_v63 = vpack.c.bf16 %v2180_v62, %v2180_v62 }
 0xc8f   : > { %3073 = vmatmul.mubr.msk.bf16.vlgmr.msra.gmra.mrb[32].mxu0 %vm991_vm2, %v2181_v63 }
 0xc90   : > { %3100 = vmatprep.mubr.msk.bf16.mxu0 %vm3520_vm1, %v3519_v2 }
 0xd62   : > { %v2242_v1 = vpop.f32.mrb[32].mxu0 }
 0xd63   : > { %v2243_v3 = vadd.f32 %v2849_v0, %v2242_v1  ;;  %v3074_v5 = vpop.f32.mrb[33].mxu0 }
 0xd64   : > { %v2245_v6 = vpop.f32.mrb[34].mxu0 }
 0xd65   : > { %v3075_v8 = vpop.f32.mrb[35].mxu0  ;;  %v2248_v9 = vadd.f32 %v2243_v3, %v4200_v13  ;;  %v3246_v13 = vld [vmem:[%s3993_s10] sm:$0xff]   ;;  %s4511_s10 = sld [smem:[#allocation27_spill]] }
 0xd66   : > { %3085 = vmatpush3.bf16.msra.mxu0 %v3246_v13 }
 0xd67   : > { %v2251_v10 = vsel %vm991_vm2, %v2248_v9, 0.0  ;;  %3086 = vmatprep.subr.bf16.mxu0 %v3519_v2 }
 0xd68   : > { %2252 = vadd.xlane.f32.xlu1 %v2251_v10 }
 0xd6a   : > { %3087 = vmatpush3.bf16.msra.mxu0 %v3247_v19 }
 0xd6b   : > { %3088 = vmatprep.subr.bf16.mxu0 %v3519_v2  ;;  %p4516_p13 = scmp.ne.s32.totalorder %s4511_s10, 0 }
 0xd6d   : > { %p3384_p3 = pnand %p3383_p7, %p4516_p13 }
 0xd6e   : > { %3089 = vmatpush3.bf16.msra.mxu0 %v3248_v20 }
 0xd6f   : > { %3090 = vmatprep.subr.bf16.mxu0 %v3519_v2  ;;  %p3385_p9 = pneg %p3384_p3 }
 0xd71   : > { %p3392_p12 = pnand %p3391_p5, %p3385_p9 }
 0xd72   : > { %3091 = vmatpush3.bf16.msra.mxu0 %v3249_v21 }
 0xd73   : > { %3092 = vmatprep.subr.bf16.mxu0 %v3519_v2 }
 0xd76   : > { %3093 = vmatpush3.bf16.msra.mxu0 %v3250_v22 }
 0xd77   : > { %3094 = vmatprep.subr.bf16.mxu0 %v3519_v2 }
 0xd7a   : > { %3095 = vmatpush3.bf16.msra.mxu0 %v3251_v23 }
 0xd7b   : > { %3096 = vmatprep.subr.bf16.mxu0 %v3519_v2 }
 0xd7e   : > { %3097 = vmatpush3.bf16.msra.mxu0 %v3252_v32 }
 0xd7f   : > { %3098 = vmatprep.subr.bf16.mxu0 %v3519_v2  ;;  %v2859_v2 = vld [vmem:[%s957_s13] ss:$0 sm:$0xff]  ;;  %s4510_s13 = sld [smem:[#allocation29_spill]] }
 0xd82   : > { %3099 = vmatpush3.bf16.msra.mxu0 %v3253_v33 }
 0xd85   : > { %s2490_s18 = scalar_lea.sflag [#allocation5], %s4510_s13 }
 0xdf5   : > { %v2253_v11 = vpop.xlane.xlu1 %2252 }
 0xdf6   : > { %v2254_v12 = vmul.f32 0.03125, %v2253_v11 }
 0xdf8   : > { %v2255_v14 = vsub.f32 %v2248_v9, %v2254_v12 }
 0xdfa   : > { %v2256_v15 = vmul.f32 %v2255_v14, %v2255_v14 }
 0xdfc   : > { %v2257_v16 = vsel %vm991_vm2, %v2256_v15, 0.0 }
 0xdfd   : > { %2258 = vadd.xlane.f32.xlu0 %v2257_v16 }
 0xe8a   : > { %v2259_v24 = vpop.xlane.xlu0 %2258 }
 0xe8b   : > { %v2260_v25 = vmul.f32 0.03125, %v2259_v24 }
 0xe8d   : > { %v2261_v7 = vadd.f32 1e-05, %v2260_v25 }
 0xe8f   : > { %3288 = vrsqrt.f32 %v2261_v7 }
 0xe99   : > { %v3289_v26 = vpop.eup %3288 }
 0xe9a   : > { %v2263_v28 = vmul.f32 %v3289_v26, %v2255_v14 }
 0xe9c   : > { %v2270_v30 = vmul.f32 %v2853_v27, %v2263_v28 }
 0xe9e   : > { %v2277_v4 = vadd.f32 %v2854_v29, %v2270_v30 }
 0xea0   : > { %v2278_v31 = vpack.c.bf16 %v2277_v4, %v2277_v4 }
 0xea2   : > { %3081 = vmatmul.mubr.msk.bf16.vlgmr.msra.gmra.mrb[48].mxu1 %vm991_vm2, %v2278_v31 }
 0xf75   : > { %v2339_v35 = vpop.f32.mrb[48].mxu1 }
 0xf76   : > { %v2340_v36 = vadd.f32 %v2855_v34, %v2339_v35  ;;  %v3082_v37 = vpop.f32.mrb[49].mxu1 }
 0xf77   : > { %v2342_v38 = vpop.f32.mrb[50].mxu1 }
 0xf78   : > { %v2345_v39 = vmax.f32 %v2340_v36, 0.0  ;;  %v3083_v40 = vpop.f32.mrb[51].mxu1 }
 0xf7a   : > { %v2346_v41 = vpack.c.bf16 %v2345_v39, %v2345_v39 }
 0xf7c   : > { %3101 = vmatmul.mubr.bf16.vlgmr.msra.gmra.mrb[36].mxu0 %v2346_v41 }
0x104f   : > { %v2452_v42 = vpop.f32.mrb[36].mxu0 }
0x1050   : > { %v2453_v43 = vadd.f32 %v2859_v2, %v2452_v42  ;;  %v3102_v44 = vpop.f32.mrb[37].mxu0 }
0x1051   : > { %v2455_v45 = vpop.f32.mrb[38].mxu0 }
0x1052   : > { %v3103_v46 = vpop.f32.mrb[39].mxu0  ;;  %v2458_v47 = vadd.f32 %v2453_v43, %v2277_v4 }
0x1054   : > { %v2461_v48 = vsel %vm991_vm2, %v2458_v47, 0.0 }
0x1055   : > { %2462 = vadd.xlane.f32.xlu0 %v2461_v48 }
0x10e2   : > { %v2463_v49 = vpop.xlane.xlu0 %2462 }
0x10e3   : > { %v2464_v50 = vmul.f32 0.03125, %v2463_v49 }
0x10e5   : > { %v2465_v51 = vsub.f32 %v2458_v47, %v2464_v50 }
0x10e7   : > { %v2466_v52 = vmul.f32 %v2465_v51, %v2465_v51 }
0x10e9   : > { %v2467_v53 = vsel %vm991_vm2, %v2466_v52, 0.0 }
0x10ea   : > { %2468 = vadd.xlane.f32.xlu1 %v2467_v53 }
0x1177   : > { %v2469_v54 = vpop.xlane.xlu1 %2468 }
0x1178   : > { %v2470_v55 = vmul.f32 0.03125, %v2469_v54 }
0x117a   : > { %v2471_v56 = vadd.f32 1e-05, %v2470_v55 }
0x117c   : > { %3290 = vrsqrt.f32 %v2471_v56 }
0x1186   : > { %v3291_v57 = vpop.eup %3290 }
0x1187   : > { %v2473_v59 = vmul.f32 %v3291_v57, %v2465_v51 }
0x1189   : > { %v2480_v61 = vmul.f32 %v2868_v58, %v2473_v59 }
0x118b   : > { %v2487_v62 = vadd.f32 %v2869_v60, %v2480_v61 }
0x118d   : > { %2488 = vst.msk [vmem:[%s4008_s12] sm:$0xff] %vm991_vm2, %v2487_v62 }
0x118e   : > { %3395 = shalt.err (!%p3392_p12)
}
0x118f   : > { %s3396_s12 = scalar_lea.hbm %s4311_s7, 128  ;;  %s3400_s6 = scalar_lea.hbm %s4515_s8, 256 }
0x1190   : > { %p3397_p0 = scmp.ne.s32.totalorder %s4311_s7, %s3396_s12  ;;  %p3401_p1 = scmp.lt.u32.totalorder %s4311_s7, %s4515_s8 }
0x1191   : > { %p3402_p10 = scmp.lt.u32.totalorder %s3400_s6, %s3396_s12  ;;  %p3404_p7 = scmp.lt.u32.totalorder %s3396_s12, %s4311_s7 }
0x1192   : > { %p3398_p2 = pnand %p3397_p0, %p4516_p13 }
0x1193   : > { %p3403_p11 = por %p3402_p10, %p3401_p1 }
0x1194   : > { %p3399_p8 = pneg %p3398_p2 }
0x1195   : > { %p3405_p3 = por %p3404_p7, %p3403_p11 }
0x1197   : > { %p3406_p9 = pnand %p3405_p3, %p3399_p8 }
0x1199   : > { %3409 = shalt.err (!%p3406_p9)
}
0x119a   : > { %3110 = dma.vmem_to_hbm [thread:$0]  (%p4516_p13), %s4313_s21, 128, %s4311_s7, %s2490_s18  }
0x119b PF: > { %s4517_s14 = sld [smem:[#allocation22_spill]]  ;;  %s4518_s24 = sld [smem:[#allocation16_spill]] }
0x119c   : > { %s4519_s29 = sld [smem:[#allocation28_spill]] }
0x11a1   : > { %p3127_p4 = scmp.ge.s32.totalorder %s4517_s14, 2  ;;  %s2515_s13 = sand.u32 1, %s4518_s24  }
0x11a2   : > { %p4520_p6 = scmp.ne.s32.totalorder %s4519_s29, 0  ;;  %s2516_s19 = scalar_lea.sflag [#allocation5], %s2515_s13 }
0x11a4   : > { %p3123_p5 = pnand %p3127_p4, %p4520_p6 }
0x11a6   : > { %3467 = dma.done.wait (!%p3123_p5), %s2516_s19, 128  }
0x11a7   : > { %3469 = vsyncadd (!%p3123_p5), %s2516_s19, 4294967168  ;;  %s38_s3 = sadd.s32 1, %s4517_s14   ;;  %s4521_s0 = sld [smem:[#allocation14_spill]] }
0x11a8   : > { %p35_p12 = scmp.ge.s32.totalorder %s38_s3, 6   ;;  %s4522_s30 = sld [smem:[#allocation15_spill]] }
0x11a9   : > { %s4523_s20 = sld [smem:[#allocation25_spill]]  ;;  %s4524_s21 = sld [smem:[#allocation17_spill]] }
0x11aa   : > { %s4525_s1 = sld [smem:[#allocation18_spill]]  ;;  %s4526_s22 = sld [smem:[#allocation26_spill]] }
0x11ab   : > { %s4527_s2 = sld [smem:[#allocation20_spill]]  ;;  %s4528_s23 = sld [smem:[#allocation21_spill]] }
0x11ac   : > { %s4529_s24 = sld [smem:[#allocation23_spill]]  ;;  %s4530_s25 = sld [smem:[#allocation24_spill]] }
0x11ad   :  { %37 = sbr.rel (!%p35_p12) target bundleno = 30 (0x1e), region = 217 }
0x11b4   :  { %2521 = vsyncpa [#allocation4], 1 }
0x11b5   :  { %2523 = vsyncpa [#allocation4 + $0x1], 1 }
0x11b6   :  { %2524 = vsyncpa [#allocation7], 1 }
0x11b7   :  { %2526 = vsyncpa [#allocation7 + $0x1], 1 }
0x11b8   :  { %2527 = vsyncpa [#allocation5], 1 }
0x11b9   :  { %2529 = vsyncpa [#allocation5 + $0x1], 1 }

</bundles_post_ra>
